<compile_context>
chip_gen: v7x
topology: tpu7x:2x2x1
jax: 0.10.0
libtpu: 0.0.40
codegen_flags: <defaults>
</compile_context>

<pallas_src>
import functools
import numpy as np
import jax
import jax.numpy as jnp
from jax.experimental import pallas as pl
from jax.experimental.pallas import tpu as pltpu

FEAT_DTYPE = jnp.bfloat16            # inter-layer feature maps / weights
VMEM_LIMIT_BYTES = 32 * 1024 * 1024  # explicit budget (safe on v5e/v6e/v7x)
ROW_CHUNK = 256                      # rows per in-vreg f32 accumulator (~32 vregs @ TN=128)


def _detect_bf16_eup():
    try:
        kind = jax.devices()[0].device_kind.lower()
        return not any(t in kind for t in ("v2", "v3", "v4", "v5"))
    except Exception:
        return True


_BF16_EUP = _detect_bf16_eup()       # v6e/v7x: bf16 EUP; v5e: keep f32 sigmoid


def _round_up(x, m):
    return ((x + m - 1) // m) * m


def _pick_tn(n):
    # TN=128 keeps output stores lane-dense and matches one MXU pass per step.
    # TODO(synk): for phi='m'/'x' widths (48/96/192/...), pad Cout to a multiple
    # of 128 at build time (zero weight cols) and carry padded channels through.
    return 128 if n % 128 == 0 else n   # sub-128 full-dim blocks are exempt


def _silu(y):
    # y is f32; run the sigmoid in bf16 where the EUP supports it.
    if _BF16_EUP:
        s = jax.nn.sigmoid(y.astype(jnp.bfloat16)).astype(jnp.float32)
    else:
        s = jax.nn.sigmoid(y)
    return y * s


# ---------------------------------------------------------------------------
# Kernel 1: fused multi-input dense (concat + 1x1 conv / head):
#           out = act(sum_i x_i @ w_i + b)
# ---------------------------------------------------------------------------
def _dense_kernel(*refs, n_in, tm, row_chunk, act):
    x_refs = refs[:n_in]
    w_refs = refs[n_in:2 * n_in]
    b_ref = refs[2 * n_in]
    o_ref = refs[2 * n_in + 1]
    bias = b_ref[...]
    for m0 in range(0, tm, row_chunk):
        mc = min(row_chunk, tm - m0)
        acc = None
        for xr, wr in zip(x_refs, w_refs):
            part = jnp.dot(xr[pl.ds(m0, mc), :], wr[...],
                           preferred_element_type=jnp.float32)
            acc = part if acc is None else acc + part
        y = acc + bias
        if act:
            y = _silu(y)
        o_ref[pl.ds(m0, mc), :] = y.astype(o_ref.dtype)


def _dense(x2ds, w, bias, act, out_dtype):
    if not isinstance(x2ds, (list, tuple)):
        x2ds = [x2ds]
    M = int(x2ds[0].shape[0])
    ks = [int(v.shape[1]) for v in x2ds]
    Ktot, Np = w.shape
    assert sum(ks) == Ktot
    offs = np.cumsum([0] + ks)
    ws = [w[int(offs[i]):int(offs[i + 1])] for i in range(len(ks))]
    # TODO(synk): add a K-reduction grid axis for contractions far beyond ~4k
    # (never hit by this model family; full-K blocks are used instead).
    TM = min(256, _round_up(M, 8))
    TN = _pick_tn(Np)
    nm, nn = pl.cdiv(M, TM), Np // TN
    n_in = len(x2ds)
    kernel = functools.partial(_dense_kernel, n_in=n_in, tm=TM,
                               row_chunk=min(TM, ROW_CHUNK), act=act)
    in_specs = ([pl.BlockSpec((TM, k), lambda i, j: (i, 0)) for k in ks]
                + [pl.BlockSpec((k, TN), lambda i, j: (0, j)) for k in ks]
                + [pl.BlockSpec((1, TN), lambda i, j: (0, j))])
    return pl.pallas_call(
        kernel,
        out_shape=jax.ShapeDtypeStruct((M, Np), out_dtype),
        grid_spec=pltpu.PrefetchScalarGridSpec(
            num_scalar_prefetch=0,
            grid=(nm, nn),
            in_specs=in_specs,
            out_specs=pl.BlockSpec((TM, TN), lambda i, j: (i, j)),
        ),
        compiler_params=pltpu.CompilerParams(
            dimension_semantics=("parallel", "parallel"),
            vmem_limit_bytes=VMEM_LIMIT_BYTES),
    )(*x2ds, *ws, bias.reshape(1, Np))


# ---------------------------------------------------------------------------
# Kernel 2: direct kxk stride-1 conv via k*k shifted matmuls (no im2col)
# ---------------------------------------------------------------------------
def _shift_conv_kernel(a_ref, h_ref, w_ref, b_ref, o_ref, xs_ref, *,
                       offsets, tm, hb, row_chunk, act):
    # Stitch the row block and its (small) halo into one contiguous VMEM scratch
    # so every shifted tap is served from VMEM.  With the Cout-tile axis outer,
    # the activation block changes on every grid step, so the stitch runs exactly
    # once per DMA'd block -- nothing to skip.
    xs_ref[0:tm, :] = a_ref[...]
    xs_ref[tm:tm + hb, :] = h_ref[...]
    bias = b_ref[...]
    for m0 in range(0, tm, row_chunk):
        mc = min(row_chunk, tm - m0)
        acc = None                      # f32 accumulator kept in vregs
        for r, off in enumerate(offsets):
            part = jnp.dot(xs_ref[pl.ds(m0 + off, mc), :], w_ref[r],
                           preferred_element_type=jnp.float32)
            acc = part if acc is None else acc + part
        y = acc + bias
        if act:
            y = _silu(y)
        o_ref[pl.ds(m0, mc), :] = y.astype(o_ref.dtype)
    # TODO(synk): if the sublane realigns of the unaligned tap slices ever bind
    # on tiny-C stem layers, pad Wp to a multiple of 8 so kh*Wp offsets align.


def _choose_tm_hb(M, halo):
    """Row-block size TM (mult of 8, >= halo) and halo-block size HB | TM, HB >= halo."""
    halo_pad = _round_up(max(halo, 8), 8)
    TM = min(256, _round_up(M, 8))
    TM = max(TM, halo_pad)
    hb = TM
    d = 8
    while d < TM:
        if TM % d == 0 and d >= halo_pad:
            hb = d
            break
        d += 8
    return TM, hb


def _shift_conv(xpad, w_kk, bias, k, act, out_dtype):
    """Direct kxk stride-1 conv on an already spatially padded NHWC tensor."""
    N, Hp, Wp, C = xpad.shape
    kk, C2, Cout = w_kk.shape
    assert kk == k * k and C2 == C
    Ho, Wo = Hp - (k - 1), Wp - (k - 1)
    offsets = tuple(kh * Wp + kw for kh in range(k) for kw in range(k))
    halo = offsets[-1]
    M = N * Hp * Wp
    TM, HB = _choose_tm_hb(M, halo)
    TN = _pick_tn(Cout)
    nm, nn = pl.cdiv(M, TM), Cout // TN
    tm_over_hb = TM // HB

    x2d = xpad.reshape(M, C)
    # pad so that every halo block ((i+1)*TM .. +HB) exists and is zero-filled
    x2d = jnp.pad(x2d, ((0, nm * TM + HB - M), (0, 0)))

    kernel = functools.partial(_shift_conv_kernel, offsets=offsets, tm=TM, hb=HB,
                               row_chunk=min(TM, ROW_CHUNK), act=act)
    # Grid order: Cout tiles OUTER, row blocks inner -> each (kk, C, TN) weight
    # tile is fetched once and stays resident across the row sweep (no nm-fold
    # weight re-streaming); activation is streamed nn times (nn is 1-4 here and
    # the activation block per step is small).
    out = pl.pallas_call(
        kernel,
        out_shape=jax.ShapeDtypeStruct((nm * TM, Cout), out_dtype),
        grid_spec=pltpu.PrefetchScalarGridSpec(
            num_scalar_prefetch=0,
            grid=(nn, nm),
            in_specs=[
                pl.BlockSpec((TM, C), lambda j, i: (i, 0)),                    # row block
                pl.BlockSpec((HB, C), lambda j, i: ((i + 1) * tm_over_hb, 0)),  # small halo
                pl.BlockSpec((kk, C, TN), lambda j, i: (0, 0, j)),             # weights
                pl.BlockSpec((1, TN), lambda j, i: (0, j)),                    # bias
            ],
            out_specs=pl.BlockSpec((TM, TN), lambda j, i: (i, j)),
            scratch_shapes=[pltpu.VMEM((TM + HB, C), x2d.dtype)],
        ),
        compiler_params=pltpu.CompilerParams(
            dimension_semantics=("parallel", "parallel"),
            vmem_limit_bytes=VMEM_LIMIT_BYTES),
    )(x2d, x2d, w_kk, bias.reshape(1, Cout))
    return out[:M].reshape(N, Hp, Wp, Cout)[:, :Ho, :Wo, :]


# ---------------------------------------------------------------------------
# Conv dispatch (Conv = Conv2d + folded BN + SiLU).  1x1 convs accept a LIST of
# inputs (virtual concat along channels, fused into the matmul).
# ---------------------------------------------------------------------------
def conv_forward(p, x, act=True, out_dtype=FEAT_DTYPE):
    xs = list(x) if isinstance(x, (list, tuple)) else [x]
    t = p['type']
    if t == '1x1':
        N, H, W, _ = xs[0].shape
        x2ds = [v.reshape(N * H * W, v.shape[-1]) for v in xs]
        y = _dense(x2ds, p['w'], p['bias'], act, out_dtype)
        return y.reshape(N, H, W, -1)
    x = xs[0] if len(xs) == 1 else jnp.concatenate(xs, axis=-1)
    if t == 's1':
        k = p['k']
        pad = k // 2
        xp = jnp.pad(x, ((0, 0), (pad, pad), (pad, pad), (0, 0)))
        return _shift_conv(xp, p['w'], p['bias'], k, act, out_dtype)
    # 's2': 3x3 stride-2 conv expressed as a 2x2 stride-1 conv on space-to-depth
    N, H, W, C = x.shape
    s2d = x.reshape(N, H // 2, 2, W // 2, 2, C).transpose(0, 1, 3, 2, 4, 5)
    s2d = s2d.reshape(N, H // 2, W // 2, 4 * C)
    xp = jnp.pad(s2d, ((0, 0), (1, 0), (1, 0), (0, 0)))
    return _shift_conv(xp, p['w'], p['bias'], 2, act, out_dtype)


# ---------------------------------------------------------------------------
# Deterministic parameter construction (eval-mode BN folded into the weights)
# ---------------------------------------------------------------------------
class ParamGen:
    def __init__(self, seed):
        self.key = jax.random.PRNGKey(seed)
        self.i = 0

    def normal(self, shape, std=1.0):
        self.i += 1
        return std * jax.random.normal(jax.random.fold_in(self.key, self.i),
                                       shape, jnp.float32)


def _fold_s2_weight(w):
    """(3,3,c1,c2) stride-2 weight -> (4, 4*c1, c2) 2x2 conv on the s2d view."""
    c1, c2 = w.shape[2], w.shape[3]
    wp = jnp.pad(w, ((1, 0), (1, 0), (0, 0), (0, 0)))    # (4,4,c1,c2)
    w2 = wp.reshape(2, 2, 2, 2, c1, c2)                  # (ky,sh,kx,sw,ci,co)
    w2 = w2.transpose(0, 2, 1, 3, 4, 5)                  # (ky,kx,sh,sw,ci,co)
    return w2.reshape(4, 4 * c1, c2)


def make_conv(pg, c1, c2, k=1, s=1):
    fan = k * k * c1
    w = pg.normal((k, k, c1, c2), std=1.0 / np.sqrt(fan))
    scale = 1.0 + 0.1 * pg.normal((c2,))      # BN gamma / sqrt(var+eps)
    shift = 0.05 * pg.normal((c2,))           # BN beta - mean*scale
    w = w * scale                             # fold BN scale into the weight
    bias = shift.astype(jnp.float32)
    if k == 1 and s == 1:
        return {'type': '1x1', 'w': w.reshape(c1, c2).astype(FEAT_DTYPE),
                'bias': bias}
    if s == 1:
        return {'type': 's1', 'k': k,
                'w': w.reshape(k * k, c1, c2).astype(FEAT_DTYPE), 'bias': bias}
    assert k == 3 and s == 2
    return {'type': 's2', 'w': _fold_s2_weight(w).astype(FEAT_DTYPE),
            'bias': bias}


def make_head(pg, c1, c2):   # plain 1x1 Conv2d with bias (no BN, no activation)
    npad = _round_up(c2, 128)                 # keep kernel output lane-dense
    w = pg.normal((c1, c2), std=1.0 / np.sqrt(c1))
    b = 0.02 * pg.normal((c2,))
    return {'type': '1x1', 'nc': c2,
            'w': jnp.pad(w, ((0, 0), (0, npad - c2))).astype(FEAT_DTYPE),
            'bias': jnp.pad(b, (0, npad - c2)).astype(jnp.float32)}


def head_forward(p, x):
    y = conv_forward(p, x, act=False, out_dtype=jnp.float32)
    return y[..., :p['nc']]


# ---------------------------------------------------------------------------
# CSPDarknet building blocks
# ---------------------------------------------------------------------------
def make_bottleneck(pg, c1, c2, shortcut=True, e=0.5):
    c_ = int(c2 * e)
    return {'cv1': make_conv(pg, c1, c_, 1, 1),
            'cv2': make_conv(pg, c_, c2, 3, 1),
            'add': bool(shortcut and c1 == c2)}


def bottleneck_forward(p, x):
    # TODO(synk): fuse the residual add into cv2's epilogue (needs a spatially
    # padded residual operand); kept as an XLA elementwise add for now.
    y = conv_forward(p['cv2'], conv_forward(p['cv1'], x))
    return x + y if p['add'] else y


def make_c3(pg, c1, c2, n=1, shortcut=True, e=0.5):
    c_ = int(c2 * e)
    return {'cv1': make_conv(pg, c1, c_, 1, 1),
            'cv2': make_conv(pg, c1, c_, 1, 1),
            'cv3': make_conv(pg, 2 * c_, c2, 1, 1),
            'm': [make_bottleneck(pg, c_, c_, shortcut, e=1.0) for _ in range(n)]}


def c3_forward(p, x):
    xs = x if isinstance(x, (list, tuple)) else [x]
    y1 = conv_forward(p['cv1'], xs)
    for b in p['m']:
        y1 = bottleneck_forward(b, y1)
    y2 = conv_forward(p['cv2'], xs)
    return conv_forward(p['cv3'], [y1, y2])          # concat fused into cv3


def _maxpool5(x):   # 5x5 stride-1 'same' max pool
    return jax.lax.reduce_window(
        x, jnp.array(-jnp.inf, x.dtype), jax.lax.max,
        (1, 5, 5, 1), (1, 1, 1, 1), ((0, 0), (2, 2), (2, 2), (0, 0)))


def make_spp(pg, c1, c2):
    c_ = c1 // 2
    return {'cv1': make_conv(pg, c1, c_, 1, 1),
            'cv2': make_conv(pg, c_ * 4, c2, 1, 1)}


def spp_forward(p, x):
    x = conv_forward(p['cv1'], x)
    p5 = _maxpool5(x)        # 5x5
    p9 = _maxpool5(p5)       # cascaded -> 9x9
    p13 = _maxpool5(p9)      # cascaded -> 13x13
    return conv_forward(p['cv2'], [x, p5, p9, p13])  # 4-way concat fused into cv2


def make_focus(pg, c1, c2, k=3):
    return {'conv': make_conv(pg, c1 * 4, c2, k, 1)}


def focus_forward(p, x):   # same slice ordering as the torch Focus module
    x = jnp.concatenate([x[:, ::2, ::2, :], x[:, 1::2, ::2, :],
                         x[:, ::2, 1::2, :], x[:, 1::2, 1::2, :]], axis=-1)
    return conv_forward(p['conv'], x)


def upsample2x(x):  # nearest, scale_factor=2 (broadcast + reshape)
    # TODO(synk): fold the nearest upsample into the consumer's index_map instead
    # of materializing the upsampled map.
    N, H, W, C = x.shape
    y = jnp.broadcast_to(x[:, :, None, :, None, :], (N, H, 2, W, 2, C))
    return y.reshape(N, 2 * H, 2 * W, C)


def make_cspdarknet(pg, bc, bd):
    return {
        'stem': make_focus(pg, 3, bc, 3),
        'dark2': {'conv': make_conv(pg, bc, bc * 2, 3, 2),
                  'c3': make_c3(pg, bc * 2, bc * 2, bd)},
        'dark3': {'conv': make_conv(pg, bc * 2, bc * 4, 3, 2),
                  'c3': make_c3(pg, bc * 4, bc * 4, bd * 3)},
        'dark4': {'conv': make_conv(pg, bc * 4, bc * 8, 3, 2),
                  'c3': make_c3(pg, bc * 8, bc * 8, bd * 3)},
        'dark5': {'conv': make_conv(pg, bc * 8, bc * 16, 3, 2),
                  'spp': make_spp(pg, bc * 16, bc * 16),
                  'c3': make_c3(pg, bc * 16, bc * 16, bd, shortcut=False)},
    }


def cspdarknet_forward(p, x):
    x = focus_forward(p['stem'], x)
    x = c3_forward(p['dark2']['c3'], conv_forward(p['dark2']['conv'], x))
    x = c3_forward(p['dark3']['c3'], conv_forward(p['dark3']['conv'], x))
    feat1 = x
    x = c3_forward(p['dark4']['c3'], conv_forward(p['dark4']['conv'], x))
    feat2 = x
    x = conv_forward(p['dark5']['conv'], x)
    x = spp_forward(p['dark5']['spp'], x)
    feat3 = c3_forward(p['dark5']['c3'], x)
    return feat1, feat2, feat3


# ---------------------------------------------------------------------------
# YoloBody
# ---------------------------------------------------------------------------
def make_yolobody(seed, anchors_mask, num_classes, phi):
    depth_dict = {'s': 0.33, 'm': 0.67, 'l': 1.0, 'x': 1.33}
    width_dict = {'s': 0.5, 'm': 0.75, 'l': 1.0, 'x': 1.25}
    dep_mul, wid_mul = depth_dict[phi], width_dict[phi]
    bc = int(wid_mul * 64)
    bd = max(round(dep_mul * 3), 1)
    pg = ParamGen(seed)
    return {
        'backbone': make_cspdarknet(pg, bc, bd),
        'conv_for_feat3': make_conv(pg, bc * 16, bc * 8, 1, 1),
        'conv3_for_upsample1': make_c3(pg, bc * 16, bc * 8, bd, shortcut=False),
        'conv_for_feat2': make_conv(pg, bc * 8, bc * 4, 1, 1),
        'conv3_for_upsample2': make_c3(pg, bc * 8, bc * 4, bd, shortcut=False),
        'down_sample1': make_conv(pg, bc * 4, bc * 4, 3, 2),
        'conv3_for_downsample1': make_c3(pg, bc * 8, bc * 8, bd, shortcut=False),
        'down_sample2': make_conv(pg, bc * 8, bc * 8, 3, 2),
        'conv3_for_downsample2': make_c3(pg, bc * 16, bc * 16, bd, shortcut=False),
        'head_p3': make_head(pg, bc * 4, len(anchors_mask[2]) * (5 + num_classes)),
        'head_p4': make_head(pg, bc * 8, len(anchors_mask[1]) * (5 + num_classes)),
        'head_p5': make_head(pg, bc * 16, len(anchors_mask[0]) * (5 + num_classes)),
    }


def yolobody_forward(p, x_nchw):
    x = jnp.transpose(x_nchw, (0, 2, 3, 1)).astype(FEAT_DTYPE)  # NCHW -> NHWC bf16
    feat1, feat2, feat3 = cspdarknet_forward(p['backbone'], x)

    P5 = conv_forward(p['conv_for_feat3'], feat3)
    P5_up = upsample2x(P5)
    P4 = c3_forward(p['conv3_for_upsample1'], [P5_up, feat2])    # concat fused
    P4 = conv_forward(p['conv_for_feat2'], P4)
    P4_up = upsample2x(P4)
    P3 = c3_forward(p['conv3_for_upsample2'], [P4_up, feat1])    # concat fused

    P3_down = conv_forward(p['down_sample1'], P3)
    P4 = c3_forward(p['conv3_for_downsample1'], [P3_down, P4])   # concat fused
    P4_down = conv_forward(p['down_sample2'], P4)
    P5 = c3_forward(p['conv3_for_downsample2'], [P4_down, P5])   # concat fused

    out2 = head_forward(p['head_p3'], P3)
    out1 = head_forward(p['head_p4'], P4)
    out0 = head_forward(p['head_p5'], P5)

    to_nchw = lambda t: jnp.transpose(t, (0, 3, 1, 2))
    return to_nchw(out0), to_nchw(out1), to_nchw(out2)


# ---------------------------------------------------------------------------
if __name__ == "__main__":
    # ---- kernel-vs-XLA reference checks (loose tolerance: bf16 kernels) ------
    def ref_conv(x, w, b, stride, pad):
        y = jax.lax.conv_general_dilated(
            x, w, window_strides=(stride, stride),
            padding=[(pad, pad), (pad, pad)],
            dimension_numbers=("NHWC", "HWIO", "NHWC"))
        return y + b.reshape(1, 1, 1, -1)

    ck = jax.random.PRNGKey(42)
    xs1 = jax.random.normal(jax.random.fold_in(ck, 0), (2, 16, 16, 16), jnp.float32)

    # 3x3 stride-1 path: multi-row-block halo (nm=3) and Cout-tiled grid (nn=2)
    w3 = jax.random.normal(jax.random.fold_in(ck, 1), (3, 3, 16, 256),
                           jnp.float32) / np.sqrt(9 * 16)
    b3 = 0.1 * jax.random.normal(jax.random.fold_in(ck, 2), (256,), jnp.float32)
    p3 = {'type': 's1', 'k': 3,
          'w': w3.reshape(9, 16, 256).astype(FEAT_DTYPE), 'bias': b3}
    got = conv_forward(p3, xs1.astype(FEAT_DTYPE), act=False, out_dtype=jnp.float32)
    np.testing.assert_allclose(np.asarray(got),
                               np.asarray(ref_conv(xs1, w3, b3, 1, 1)),
                               atol=0.1, rtol=0.05)

    # 3x3 stride-2 path (space-to-depth folded weights)
    w3s = jax.random.normal(jax.random.fold_in(ck, 3), (3, 3, 16, 64),
                            jnp.float32) / np.sqrt(9 * 16)
    b3s = 0.1 * jax.random.normal(jax.random.fold_in(ck, 4), (64,), jnp.float32)
    p3s = {'type': 's2', 'w': _fold_s2_weight(w3s).astype(FEAT_DTYPE), 'bias': b3s}
    got = conv_forward(p3s, xs1.astype(FEAT_DTYPE), act=False, out_dtype=jnp.float32)
    np.testing.assert_allclose(np.asarray(got),
                               np.asarray(ref_conv(xs1, w3s, b3s, 2, 1)),
                               atol=0.1, rtol=0.05)

    # fused (concat + 1x1 conv + SiLU) path
    xa = jax.random.normal(jax.random.fold_in(ck, 5), (2, 4, 4, 16), jnp.float32)
    xb = jax.random.normal(jax.random.fold_in(ck, 6), (2, 4, 4, 24), jnp.float32)
    w1 = jax.random.normal(jax.random.fold_in(ck, 7), (40, 64), jnp.float32) / np.sqrt(40)
    b1 = 0.1 * jax.random.normal(jax.random.fold_in(ck, 8), (64,), jnp.float32)
    p1 = {'type': '1x1', 'w': w1.astype(FEAT_DTYPE), 'bias': b1}
    got = conv_forward(p1, [xa.astype(FEAT_DTYPE), xb.astype(FEAT_DTYPE)],
                       act=True, out_dtype=jnp.float32)
    yref = jnp.concatenate([xa, xb], -1).reshape(-1, 40) @ w1 + b1
    yref = (yref * jax.nn.sigmoid(yref)).reshape(2, 4, 4, 64)
    np.testing.assert_allclose(np.asarray(got), np.asarray(yref),
                               atol=0.1, rtol=0.05)

    # ---- full model (NOTE: at 64x64 every grid is tiny; benchmark at 640) ----
    anchors_mask = [[6, 7, 8], [3, 4, 5], [0, 1, 2]]
    num_classes = 4
    phi = 's'
    params = make_yolobody(0, anchors_mask, num_classes, phi)

    x = jax.random.normal(jax.random.PRNGKey(0), (2, 3, 64, 64), jnp.float32)
    fwd = jax.jit(lambda inp: yolobody_forward(params, inp))
    out0, out1, out2 = fwd(x)
    jax.block_until_ready((out0, out1, out2))

    na_ch = 3 * (5 + num_classes)
    assert out0.shape == (2, na_ch, 2, 2), out0.shape     # P5 head, stride 32
    assert out1.shape == (2, na_ch, 4, 4), out1.shape     # P4 head, stride 16
    assert out2.shape == (2, na_ch, 8, 8), out2.shape     # P3 head, stride 8
    assert all(o.dtype == jnp.float32 for o in (out0, out1, out2))
    assert all(bool(jnp.all(jnp.isfinite(o))) for o in (out0, out1, out2))

    print("KERNEL_OK")
</pallas_src>

<mosaic_0001>
module attributes {stable_mosaic.version = 11 : i64} {
  func.func @_shift_conv_kernel(%arg0: i32, %arg1: i32, %arg2: memref<256x16xbf16, #tpu.memory_space<vmem>>, %arg3: memref<64x16xbf16, #tpu.memory_space<vmem>>, %arg4: memref<9x16x128xbf16, #tpu.memory_space<vmem>>, %arg5: memref<1x128xf32, #tpu.memory_space<vmem>>, %arg6: memref<256x128xf32, #tpu.memory_space<vmem>>, %arg7: memref<320x16xbf16, #tpu.memory_space<vmem>>) attributes {dimension_semantics = [#tpu.dimension_semantics<parallel>, #tpu.dimension_semantics<parallel>], iteration_bounds = array<i64: 2, 3>, scalar_prefetch = 0 : i64, scratch_operands = 1 : i64, tpu.core_type = #tpu.core_type<tc>, window_params = [{transform_indices = @transform_0, window_bounds = array<i64: 256, 16>}, {transform_indices = @transform_1, window_bounds = array<i64: 64, 16>}, {transform_indices = @transform_2, window_bounds = array<i64: 9, 16, 128>}, {transform_indices = @transform_3, window_bounds = array<i64: 1, 128>}, {transform_indices = @transform_4, window_bounds = array<i64: 256, 128>}]} {
    %c0 = arith.constant 0 : index
    %c0_0 = arith.constant 0 : index
    %0 = vector.load %arg2[%c0, %c0_0] : memref<256x16xbf16, #tpu.memory_space<vmem>>, vector<256x16xbf16>
    %c0_1 = arith.constant 0 : index
    %c0_2 = arith.constant 0 : index
    %1 = vector.load %arg7[%c0_1, %c0_2] : memref<320x16xbf16, #tpu.memory_space<vmem>>, vector<256x16xbf16>
    tpu.vector_store %arg7[%c0_1, %c0_2], %0 {strides = array<i32>} : memref<320x16xbf16, #tpu.memory_space<vmem>>, vector<256x16xbf16>,
    %c0_3 = arith.constant 0 : index
    %c0_4 = arith.constant 0 : index
    %2 = vector.load %arg3[%c0_3, %c0_4] : memref<64x16xbf16, #tpu.memory_space<vmem>>, vector<64x16xbf16>
    %c256 = arith.constant 256 : index
    %c0_5 = arith.constant 0 : index
    %3 = vector.load %arg7[%c256, %c0_5] : memref<320x16xbf16, #tpu.memory_space<vmem>>, vector<64x16xbf16>
    tpu.vector_store %arg7[%c256, %c0_5], %2 {strides = array<i32>} : memref<320x16xbf16, #tpu.memory_space<vmem>>, vector<64x16xbf16>,
    %c0_6 = arith.constant 0 : index
    %c0_7 = arith.constant 0 : index
    %4 = vector.load %arg5[%c0_6, %c0_7] : memref<1x128xf32, #tpu.memory_space<vmem>>, vector<1x128xf32>
    %c0_8 = arith.constant 0 : index
    %c0_9 = arith.constant 0 : index
    %5 = vector.load %arg7[%c0_8, %c0_9] : memref<320x16xbf16, #tpu.memory_space<vmem>>, vector<256x16xbf16>
    %c0_10 = arith.constant 0 : index
    %c0_11 = arith.constant 0 : index
    %c0_12 = arith.constant 0 : index
    %6 = vector.load %arg4[%c0_10, %c0_11, %c0_12] : memref<9x16x128xbf16, #tpu.memory_space<vmem>>, vector<1x16x128xbf16>
    %7 = vector.shape_cast %6 : vector<1x16x128xbf16> to vector<16x128xbf16>
    %cst = arith.constant dense<0.000000e+00> : vector<256x128xf32>
    %8 = tpu.matmul %5, %7, %cst {dimension_numbers = #tpu.dot_dimension_numbers<[1], [0], [0], [1], [0, 0, 1, 1], [], []>} : vector<256x16xbf16>, vector<16x128xbf16>, vector<256x128xf32> -> vector<256x128xf32>
    %c1 = arith.constant 1 : index
    %c0_13 = arith.constant 0 : index
    %9 = vector.load %arg7[%c1, %c0_13] : memref<320x16xbf16, #tpu.memory_space<vmem>>, vector<256x16xbf16>
    %c1_14 = arith.constant 1 : index
    %c0_15 = arith.constant 0 : index
    %c0_16 = arith.constant 0 : index
    %10 = vector.load %arg4[%c1_14, %c0_15, %c0_16] : memref<9x16x128xbf16, #tpu.memory_space<vmem>>, vector<1x16x128xbf16>
    %11 = vector.shape_cast %10 : vector<1x16x128xbf16> to vector<16x128xbf16>
    %cst_17 = arith.constant dense<0.000000e+00> : vector<256x128xf32>
    %12 = tpu.matmul %9, %11, %cst_17 {dimension_numbers = #tpu.dot_dimension_numbers<[1], [0], [0], [1], [0, 0, 1, 1], [], []>} : vector<256x16xbf16>, vector<16x128xbf16>, vector<256x128xf32> -> vector<256x128xf32>
    %13 = arith.addf %8, %12 : vector<256x128xf32>
    %c2 = arith.constant 2 : index
    %c0_18 = arith.constant 0 : index
    %14 = vector.load %arg7[%c2, %c0_18] : memref<320x16xbf16, #tpu.memory_space<vmem>>, vector<256x16xbf16>
    %c2_19 = arith.constant 2 : index
    %c0_20 = arith.constant 0 : index
    %c0_21 = arith.constant 0 : index
    %15 = vector.load %arg4[%c2_19, %c0_20, %c0_21] : memref<9x16x128xbf16, #tpu.memory_space<vmem>>, vector<1x16x128xbf16>
    %16 = vector.shape_cast %15 : vector<1x16x128xbf16> to vector<16x128xbf16>
    %cst_22 = arith.constant dense<0.000000e+00> : vector<256x128xf32>
    %17 = tpu.matmul %14, %16, %cst_22 {dimension_numbers = #tpu.dot_dimension_numbers<[1], [0], [0], [1], [0, 0, 1, 1], [], []>} : vector<256x16xbf16>, vector<16x128xbf16>, vector<256x128xf32> -> vector<256x128xf32>
    %18 = arith.addf %13, %17 : vector<256x128xf32>
    %c18 = arith.constant 18 : index
    %c0_23 = arith.constant 0 : index
    %19 = vector.load %arg7[%c18, %c0_23] : memref<320x16xbf16, #tpu.memory_space<vmem>>, vector<256x16xbf16>
    %c3 = arith.constant 3 : index
    %c0_24 = arith.constant 0 : index
    %c0_25 = arith.constant 0 : index
    %20 = vector.load %arg4[%c3, %c0_24, %c0_25] : memref<9x16x128xbf16, #tpu.memory_space<vmem>>, vector<1x16x128xbf16>
    %21 = vector.shape_cast %20 : vector<1x16x128xbf16> to vector<16x128xbf16>
    %cst_26 = arith.constant dense<0.000000e+00> : vector<256x128xf32>
    %22 = tpu.matmul %19, %21, %cst_26 {dimension_numbers = #tpu.dot_dimension_numbers<[1], [0], [0], [1], [0, 0, 1, 1], [], []>} : vector<256x16xbf16>, vector<16x128xbf16>, vector<256x128xf32> -> vector<256x128xf32>
    %23 = arith.addf %18, %22 : vector<256x128xf32>
    %c19 = arith.constant 19 : index
    %c0_27 = arith.constant 0 : index
    %24 = vector.load %arg7[%c19, %c0_27] : memref<320x16xbf16, #tpu.memory_space<vmem>>, vector<256x16xbf16>
    %c4 = arith.constant 4 : index
    %c0_28 = arith.constant 0 : index
    %c0_29 = arith.constant 0 : index
    %25 = vector.load %arg4[%c4, %c0_28, %c0_29] : memref<9x16x128xbf16, #tpu.memory_space<vmem>>, vector<1x16x128xbf16>
    %26 = vector.shape_cast %25 : vector<1x16x128xbf16> to vector<16x128xbf16>
    %cst_30 = arith.constant dense<0.000000e+00> : vector<256x128xf32>
    %27 = tpu.matmul %24, %26, %cst_30 {dimension_numbers = #tpu.dot_dimension_numbers<[1], [0], [0], [1], [0, 0, 1, 1], [], []>} : vector<256x16xbf16>, vector<16x128xbf16>, vector<256x128xf32> -> vector<256x128xf32>
    %28 = arith.addf %23, %27 : vector<256x128xf32>
    %c20 = arith.constant 20 : index
    %c0_31 = arith.constant 0 : index
    %29 = vector.load %arg7[%c20, %c0_31] : memref<320x16xbf16, #tpu.memory_space<vmem>>, vector<256x16xbf16>
    %c5 = arith.constant 5 : index
    %c0_32 = arith.constant 0 : index
    %c0_33 = arith.constant 0 : index
    %30 = vector.load %arg4[%c5, %c0_32, %c0_33] : memref<9x16x128xbf16, #tpu.memory_space<vmem>>, vector<1x16x128xbf16>
    %31 = vector.shape_cast %30 : vector<1x16x128xbf16> to vector<16x128xbf16>
    %cst_34 = arith.constant dense<0.000000e+00> : vector<256x128xf32>
    %32 = tpu.matmul %29, %31, %cst_34 {dimension_numbers = #tpu.dot_dimension_numbers<[1], [0], [0], [1], [0, 0, 1, 1], [], []>} : vector<256x16xbf16>, vector<16x128xbf16>, vector<256x128xf32> -> vector<256x128xf32>
    %33 = arith.addf %28, %32 : vector<256x128xf32>
    %c36 = arith.constant 36 : index
    %c0_35 = arith.constant 0 : index
    %34 = vector.load %arg7[%c36, %c0_35] : memref<320x16xbf16, #tpu.memory_space<vmem>>, vector<256x16xbf16>
    %c6 = arith.constant 6 : index
    %c0_36 = arith.constant 0 : index
    %c0_37 = arith.constant 0 : index
    %35 = vector.load %arg4[%c6, %c0_36, %c0_37] : memref<9x16x128xbf16, #tpu.memory_space<vmem>>, vector<1x16x128xbf16>
    %36 = vector.shape_cast %35 : vector<1x16x128xbf16> to vector<16x128xbf16>
    %cst_38 = arith.constant dense<0.000000e+00> : vector<256x128xf32>
    %37 = tpu.matmul %34, %36, %cst_38 {dimension_numbers = #tpu.dot_dimension_numbers<[1], [0], [0], [1], [0, 0, 1, 1], [], []>} : vector<256x16xbf16>, vector<16x128xbf16>, vector<256x128xf32> -> vector<256x128xf32>
    %38 = arith.addf %33, %37 : vector<256x128xf32>
    %c37 = arith.constant 37 : index
    %c0_39 = arith.constant 0 : index
    %39 = vector.load %arg7[%c37, %c0_39] : memref<320x16xbf16, #tpu.memory_space<vmem>>, vector<256x16xbf16>
    %c7 = arith.constant 7 : index
    %c0_40 = arith.constant 0 : index
    %c0_41 = arith.constant 0 : index
    %40 = vector.load %arg4[%c7, %c0_40, %c0_41] : memref<9x16x128xbf16, #tpu.memory_space<vmem>>, vector<1x16x128xbf16>
    %41 = vector.shape_cast %40 : vector<1x16x128xbf16> to vector<16x128xbf16>
    %cst_42 = arith.constant dense<0.000000e+00> : vector<256x128xf32>
    %42 = tpu.matmul %39, %41, %cst_42 {dimension_numbers = #tpu.dot_dimension_numbers<[1], [0], [0], [1], [0, 0, 1, 1], [], []>} : vector<256x16xbf16>, vector<16x128xbf16>, vector<256x128xf32> -> vector<256x128xf32>
    %43 = arith.addf %38, %42 : vector<256x128xf32>
    %c38 = arith.constant 38 : index
    %c0_43 = arith.constant 0 : index
    %44 = vector.load %arg7[%c38, %c0_43] : memref<320x16xbf16, #tpu.memory_space<vmem>>, vector<256x16xbf16>
    %c8 = arith.constant 8 : index
    %c0_44 = arith.constant 0 : index
    %c0_45 = arith.constant 0 : index
    %45 = vector.load %arg4[%c8, %c0_44, %c0_45] : memref<9x16x128xbf16, #tpu.memory_space<vmem>>, vector<1x16x128xbf16>
    %46 = vector.shape_cast %45 : vector<1x16x128xbf16> to vector<16x128xbf16>
    %cst_46 = arith.constant dense<0.000000e+00> : vector<256x128xf32>
    %47 = tpu.matmul %44, %46, %cst_46 {dimension_numbers = #tpu.dot_dimension_numbers<[1], [0], [0], [1], [0, 0, 1, 1], [], []>} : vector<256x16xbf16>, vector<16x128xbf16>, vector<256x128xf32> -> vector<256x128xf32>
    %48 = arith.addf %43, %47 : vector<256x128xf32>
    %49 = vector.broadcast %4 : vector<1x128xf32> to vector<256x128xf32>
    %50 = arith.addf %48, %49 : vector<256x128xf32>
    %c0_47 = arith.constant 0 : index
    %c0_48 = arith.constant 0 : index
    %51 = vector.load %arg6[%c0_47, %c0_48] : memref<256x128xf32, #tpu.memory_space<vmem>>, vector<256x128xf32>
    tpu.vector_store %arg6[%c0_47, %c0_48], %50 {strides = array<i32>} : memref<256x128xf32, #tpu.memory_space<vmem>>, vector<256x128xf32>,
    return
  }
  func.func @transform_0(%arg0: i32, %arg1: i32) -> (i32, i32) {
    %c0_i32 = arith.constant 0 : i32
    %c0_i32_0 = arith.constant 0 : i32
    return %arg1, %c0_i32 : i32, i32
  }
  func.func @transform_1(%arg0: i32, %arg1: i32) -> (i32, i32) {
    %c1_i32 = arith.constant 1 : i32
    %0 = arith.addi %arg1, %c1_i32 : i32
    %c4_i32 = arith.constant 4 : i32
    %1 = arith.muli %0, %c4_i32 : i32
    %c0_i32 = arith.constant 0 : i32
    %c0_i32_0 = arith.constant 0 : i32
    return %1, %c0_i32 : i32, i32
  }
  func.func @transform_2(%arg0: i32, %arg1: i32) -> (i32, i32, i32) {
    %c0_i32 = arith.constant 0 : i32
    %c0_i32_0 = arith.constant 0 : i32
    %c0_i32_1 = arith.constant 0 : i32
    return %c0_i32, %c0_i32_0, %arg0 : i32, i32, i32
  }
  func.func @transform_3(%arg0: i32, %arg1: i32) -> (i32, i32) {
    %c0_i32 = arith.constant 0 : i32
    %c0_i32_0 = arith.constant 0 : i32
    return %c0_i32, %arg0 : i32, i32
  }
  func.func @transform_4(%arg0: i32, %arg1: i32) -> (i32, i32) {
    %c0_i32 = arith.constant 0 : i32
    return %arg1, %arg0 : i32, i32
  }
}

</mosaic_0001>

<bundles_post_ra>
// kernel: tpu_custom_call.1
= control target key start
LH: loop header
LB: loop body
LE: loop exit
PB: predicated region body
PF: predicated region fallthrough
CT: control target
= control target key end

     0   :  { %9 = vsyncpa [#allocation5], 0  ;;  %s5956_s0 = inlined_call_operand.vmem [shape: bf16[832,16], index: 0, kind: input, shape index: {}]   ;;  %s5957_s1 = inlined_call_operand.vmem [shape: bf16[832,16], index: 1, kind: input, shape index: {}]   ;;  %s5958_s2 = inlined_call_operand.vmem [shape: bf16[9,16,256], index: 2, kind: input, shape index: {}]   ;;  %s5959_s3 = inlined_call_operand.vmem [shape: f32[1,256], index: 3, kind: input, shape index: {}]   ;;  %s5960_s4 = inlined_call_operand.hbm [shape: f32[768,256], index: 4, kind: output, shape index: {}]  }
   0x1   :  { %11 = vsyncpa [#allocation5 + $0x1], 0  ;;  %s4881_s15 = smov 0   ;;  %s4883_s16 = smov 0  }
   0x2   :  { %s4885_s17 = smov 0   ;;  %s4887_s18 = smov 0  }
   0x3   :  { %s4889_s19 = smov 0   ;;  %s4891_s20 = smov 0  }
   0x4   :  { %s4893_s21 = smov 0   ;;  %s4895_s22 = smov 0  }
   0x5   :  { %s4897_s23 = smov 0   ;;  %s4899_s24 = smov 0  }
   0x6 LB: > { %s3682_s25 = sadd.s32 4294967295, %s4850_s24   ;;  %s3683_s26 = sadd.s32 4294967294, %s4850_s24   ;;  %s4850_s24 = sphi %s4899_s24, %s17_s24   ;;  %s4846_s23 = sphi %s4897_s23, %s5997_s23   ;;  %s4842_s22 = sphi %s4895_s22, %s5996_s22   ;;  %s4838_s21 = sphi %s4893_s21, %s5995_s21   ;;  %s4834_s20 = sphi %s4891_s20, %s5994_s20   ;;  %s4830_s19 = sphi %s4889_s19, %s5993_s19   ;;  %s4826_s18 = sphi %s4887_s18, %s5992_s18   ;;  %s4822_s17 = sphi %s4885_s17, %s5991_s17   ;;  %s4818_s16 = sphi %s4883_s16, %s5990_s16   ;;  %s4814_s15 = sphi %s4881_s15, %s5989_s15  }
   0x7   : > { %s26_s27 = sadd.s32 1, %s4842_s22  ;;  %s29_s28 = sadd.s32 1, %s4846_s23 }
   0x8   : > { %p27_p0 = scmp.ge.s32.totalorder %s26_s27, 3  ;;  %s92_s29 = sadd.s32 1, %s4830_s19 }
   0x9   : > { %p99_p1 = scmp.ne.s32.totalorder %s4830_s19, %s4826_s18  ;;  %p100_p2 = scmp.eq.s32.totalorder %s4850_s24, 0 }
   0xa   : > { %s5999_s27 = smov (%p27_p0, %s26_s27), 0  ;;  %s6001_s28 = smov (!%p27_p0, %s29_s28), %s4846_s23 }
   0xb   : > { %p4942_p3 = por %p100_p2, %p99_p1  ;;  %s141_s5 = ssub.s32 %s4842_s22, %s5999_s27 }
   0xc   : > { %p31_p4 = scmp.ge.s32.totalorder %s6001_s28, 2  ;;  %s146_s6 = sadd.s32 1, %s4822_s17 }
   0xd   : > { %p156_p5 = scmp.ne.s32.totalorder %s4822_s17, %s4818_s16  ;;  %p157_p6 = scmp.eq.s32.totalorder %s3682_s25, 5 }
   0xe   : > { %s6003_s28 = smov (%p31_p4, %s6001_s28), 0  ;;  %p162_p8 = scmp.ne.s32.totalorder %s4818_s16, %s4814_s15 }
   0xf   : > { %p4953_p7 = por %p157_p6, %p156_p5  ;;  %s89_s8 = ssub.s32 %s4846_s23, %s6003_s28 }
  0x10   : > { %p163_p9 = scmp.eq.s32.totalorder %s3683_s26, 5  ;;  %p90_p10 = scmp.eq.s32.totalorder %s89_s8, 0 }
  0x11   : > { %s143_s9 = sor.u32 %s141_s5, %s89_s8  ;;  %p3687_p13 = scmp.ge.s32.totalorder %s4850_s24, 6 }
  0x12   : > { %p144_p11 = scmp.eq.s32.totalorder %s143_s9, 0  ;;  %p4961_p12 = por %p163_p9, %p162_p8 }
  0x13   : > { %s4966_s11 = scalar_select %p90_p10, %s4830_s19, %s92_s29  }
  0x14   : > { %s4969_s12 = scalar_select %p144_p11, %s4822_s17, %s146_s6  }
  0x15   : > { %179 = sbr.rel (%p3687_p13) target bundleno = 44 (0x2c), region = 16 }
  0x1c   : > { %212 = sbr.rel (!%p4942_p3) target bundleno = 44 (0x2c), region = 28  ;;  %s214_s13 = sand.u32 (%p4942_p3), 1, %s4830_s19  }
  0x1d   : > { %s3688_s14 = sshll.u32 (%p4942_p3), %s4846_s23, 2  ;;  %s4619_s25 = smul.u32 (%p4942_p3), 72, %s214_s13 }
  0x1e   : > { %s4979_s8 = scalar_lea.vmem (%p4942_p3), %s5958_s2, %s3688_s14 }
  0x1f   : > { %v234_v0 = vld [vmem:[%s4979_s8] sm:$0xf] (%p4942_p3)  ;;  %v236_v1 = vld [vmem:[%s4979_s8 + $0x8] sm:$0xf] (%p4942_p3)  ;;  %v238_v2 = vld [vmem:[%s4979_s8 + $0x10] sm:$0xf] (%p4942_p3) }
  0x20   : > { %v240_v3 = vld [vmem:[%s4979_s8 + $0x18] sm:$0xf] (%p4942_p3)  ;;  %v242_v4 = vld [vmem:[%s4979_s8 + $0x20] sm:$0xf] (%p4942_p3)  ;;  %s4986_s29 = scalar_lea.vmem (%p4942_p3), [#allocation3], %s4619_s25 }
  0x21   : > { %235 = vst [vmem:[%s4986_s29] sm:$0xf] (%p4942_p3), %v234_v0  ;;  %237 = vst [vmem:[%s4986_s29 + $0x4] sm:$0xf] (%p4942_p3), %v236_v1  ;;  %v244_v5 = vld [vmem:[%s4979_s8 + $0x28] sm:$0xf] (%p4942_p3) }
  0x22   : > { %239 = vst [vmem:[%s4986_s29 + $0x8] sm:$0xf] (%p4942_p3), %v238_v2  ;;  %241 = vst [vmem:[%s4986_s29 + $0xc] sm:$0xf] (%p4942_p3), %v240_v3  ;;  %v246_v6 = vld [vmem:[%s4979_s8 + $0x30] sm:$0xf] (%p4942_p3) }
  0x23   : > { %243 = vst [vmem:[%s4986_s29 + $0x10] sm:$0xf] %v242_v4  ;;  %v248_v7 = vld [vmem:[%s4979_s8 + $0x38] sm:$0xf]  ;;  %245 = vst [vmem:[%s4986_s29 + $0x14] sm:$0xf] %v244_v5 }
  0x24   : > { %247 = vst [vmem:[%s4986_s29 + $0x18] sm:$0xf] %v246_v6  ;;  %249 = vst [vmem:[%s4986_s29 + $0x1c] sm:$0xf] %v248_v7  ;;  %v250_v8 = vld [vmem:[%s4979_s8 + $0x40] sm:$0xf] }
  0x25   : > { %v252_v9 = vld [vmem:[%s4979_s8 + $0x48] sm:$0xf]  ;;  %v254_v10 = vld [vmem:[%s4979_s8 + $0x50] sm:$0xf]  ;;  %251 = vst [vmem:[%s4986_s29 + $0x20] sm:$0xf] %v250_v8 }
  0x26   : > { %253 = vst [vmem:[%s4986_s29 + $0x24] sm:$0xf] %v252_v9  ;;  %255 = vst [vmem:[%s4986_s29 + $0x28] sm:$0xf] %v254_v10  ;;  %v256_v11 = vld [vmem:[%s4979_s8 + $0x58] sm:$0xf] }
  0x27   : > { %v258_v12 = vld [vmem:[%s4979_s8 + $0x60] sm:$0xf]  ;;  %v260_v13 = vld [vmem:[%s4979_s8 + $0x68] sm:$0xf]  ;;  %257 = vst [vmem:[%s4986_s29 + $0x2c] sm:$0xf] %v256_v11 }
  0x28   : > { %259 = vst [vmem:[%s4986_s29 + $0x30] sm:$0xf] %v258_v12  ;;  %261 = vst [vmem:[%s4986_s29 + $0x34] sm:$0xf] %v260_v13  ;;  %v262_v14 = vld [vmem:[%s4979_s8 + $0x70] sm:$0xf] }
  0x29   : > { %v264_v15 = vld [vmem:[%s4979_s8 + $0x78] sm:$0xf]  ;;  %v266_v16 = vld [vmem:[%s4979_s8 + $0x80] sm:$0xf]  ;;  %263 = vst [vmem:[%s4986_s29 + $0x38] sm:$0xf] %v262_v14 }
  0x2a   : > { %265 = vst [vmem:[%s4986_s29 + $0x3c] sm:$0xf] %v264_v15  ;;  %267 = vst [vmem:[%s4986_s29 + $0x40] sm:$0xf] %v266_v16  ;;  %v268_v17 = vld [vmem:[%s4979_s8 + $0x88] sm:$0xf] }
  0x2b   : > { %269 = vst [vmem:[%s4986_s29 + $0x44] sm:$0xf] %v268_v17 }
  0x2c PF: > { %p3689_p0 = scmp.ge.s32.totalorder %s4850_s24, 1  ;;  %p333_p1 = scmp.lt.s32.totalorder %s4850_s24, 7 }
  0x2e   : > { %p334_p2 = pnand %p3689_p0, %p333_p1 }
  0x30   : > { %337 = sbr.rel (%p334_p2) target bundleno = 597 (0x255), region = 73 }
  0x37   : > { %s340_s30 = sand.u32 1, %s4826_s18   ;;  %s5023_s6 = sshll.u32 %s4834_s20, 5  ;;  %vm541_vm0 = vcmask 130048   ;;  %vm617_vm1 = vsmask.f32 7424  ;;  %vm2193_vm3 = vcmask 1045504  }
  0x38   : > { %s4620_s9 = smul.u32 72, %s340_s30  ;;  %p389_p3 = scmp.lt.s32.totalorder %s5023_s6, 103  ;;  %vm1787_vm2 = vsmask.f32 6400  ;;  %vm2795_vm4 = vsmask.f32 5376 }
  0x39   : > { %s3901_s8 = sadd.s32 32, %s5023_s6  ;;  %vm1185_vm5 = vcmask 1046528   ;;  %vm3201_vm6 = vcmask 1044480   ;;  %p408_p5 = scmp.lt.s32.totalorder %s4838_s21, 1 }
  0x3a   : > { %s5026_s13 = scalar_lea.vmem [#allocation3], %s4620_s9  ;;  %p401_p4 = scmp.lt.s32.totalorder %s3901_s8, 103 }
  0x3b   : > { %v4711_v18 = vld [vmem:[%s5026_s13 + $0x8] sm:$0xff]   ;;  %s390_s14 = scalar_select %p389_p3, %s5023_s6, 103  ;;  %v5031_v19 = vld [vmem:[%s5026_s13 + $0x20] sm:$0xff]   ;;  %v5131_v13 = vld [vmem:[%s5026_s13 + $0x30] sm:$0xff]  }
  0x3c   : > { %4055 = vmatprep.subr.bf16.mxu1 %v4711_v18  ;;  %v5034_v20 = vld [vmem:[%s5026_s13] sm:$0xff]   ;;  %4191 = vmatprep.subr.bf16.mxu0 %v5031_v19  ;;  %v5043_v21 = vld [vmem:[%s5026_s13 + $0x28] sm:$0xff]   ;;  %s6005_s8 = smov (!%p401_p4, %s3901_s8), 103 }
  0x3d   : > { %s3692_s25 = sshll.u32 %s390_s14, 2  ;;  %4056 = vmatpush3.bf16.msra.mxu1 %v4711_v18  ;;  %4192 = vmatpush3.bf16.msra.mxu0 %v5031_v19  ;;  %s3695_s29 = sshll.u32 %s6005_s8, 2 }
  0x3e   : > { %s5040_s5 = scalar_lea.vmem %s5956_s0, %s3692_s25  ;;  %4089 = vmatprep.subr.bf16.mxu1 %v5034_v20  ;;  %4225 = vmatprep.subr.bf16.mxu0 %v5043_v21  ;;  %s5122_s9 = scalar_lea.vmem %s5957_s1, %s3695_s29 }
  0x3f   : > { %v4713_v22 = vld [vmem:[%s5040_s5] sm:$0xff]   ;;  %v4714_v23 = vld [vmem:[%s5040_s5 + $0x8] sm:$0xff]   ;;  %v4716_v24 = vld [vmem:[%s5040_s5 + $0x10] sm:$0xff]   ;;  %s381_s14 = sand.u32 1, %s4818_s16   ;;  %s3899_s29 = sshll.u32 %s4834_s20, 6 }
  0x40   : > { %542 = vst.msk [vmem:[#allocation2] sm:$0xff] %vm541_vm0, %v4713_v22  ;;  %543 = vst.msk [vmem:[#allocation2 + $0x8] sm:$0xff] %vm541_vm0, %v4714_v23  ;;  %v4718_v25 = vld [vmem:[%s5040_s5 + $0x18] sm:$0xff]   ;;  %v4719_v26 = vld [vmem:[%s5040_s5 + $0x20] sm:$0xff]   ;;  %s3565_s30 = sadd.s32 %s4838_s21, %s3899_s29  ;;  %s5898_s25 = scalar_lea.sflag [#allocation5], %s381_s14 }
  0x41   : > { %544 = vst.msk [vmem:[#allocation2 + $0x10] sm:$0xff] %vm541_vm0, %v4716_v24  ;;  %545 = vst.msk [vmem:[#allocation2 + $0x18] sm:$0xff] %vm541_vm0, %v4718_v25  ;;  %v4720_v27 = vld [vmem:[%s5040_s5 + $0x28] sm:$0xff]   ;;  %v4721_v28 = vld [vmem:[%s5040_s5 + $0x30] sm:$0xff]   ;;  %s3889_s20 = sshll.u32 %s3565_s30, 7 }
  0x42   : > { %546 = vst.msk [vmem:[#allocation2 + $0x20] sm:$0xff] %vm541_vm0, %v4719_v26  ;;  %547 = vst.msk [vmem:[#allocation2 + $0x28] sm:$0xff] %vm541_vm0, %v4720_v27  ;;  %v4722_v29 = vld [vmem:[%s5040_s5 + $0x38] sm:$0xff]   ;;  %v4723_v30 = vld [vmem:[%s5040_s5 + $0x40] sm:$0xff]  }
  0x43   : > { %548 = vst.msk [vmem:[#allocation2 + $0x30] sm:$0xff] %vm541_vm0, %v4721_v28  ;;  %549 = vst.msk [vmem:[#allocation2 + $0x38] sm:$0xff] %vm541_vm0, %v4722_v29  ;;  %v4724_v31 = vld [vmem:[%s5040_s5 + $0x48] sm:$0xff]   ;;  %v4726_v45 = vld [vmem:[%s5040_s5 + $0x50] sm:$0xff]  }
  0x44   : > { %550 = vst.msk [vmem:[#allocation2 + $0x40] sm:$0xff] %vm541_vm0, %v4723_v30  ;;  %551 = vst.msk [vmem:[#allocation2 + $0x48] sm:$0xff] %vm541_vm0, %v4724_v31  ;;  %v4727_v50 = vld [vmem:[%s5040_s5 + $0x58] sm:$0xff]   ;;  %v4728_v56 = vld [vmem:[%s5040_s5 + $0x60] sm:$0xff]  }
  0x45   : > { %552 = vst.msk [vmem:[#allocation2 + $0x50] sm:$0xff] %vm541_vm0, %v4726_v45  ;;  %553 = vst.msk [vmem:[#allocation2 + $0x58] sm:$0xff] %vm541_vm0, %v4727_v50  ;;  %v4729_v61 = vld [vmem:[%s5040_s5 + $0x68] sm:$0xff]   ;;  %v4730_v3 = vld [vmem:[%s5040_s5 + $0x70] sm:$0xff]  }
  0x46   : > { %554 = vst.msk [vmem:[#allocation2 + $0x60] sm:$0xff] %vm541_vm0, %v4728_v56  ;;  %555 = vst.msk [vmem:[#allocation2 + $0x68] sm:$0xff] %vm541_vm0, %v4729_v61  ;;  %v4731_v18 = vld [vmem:[%s5040_s5 + $0x78] sm:$0xff]   ;;  %v4732_v26 = vld [vmem:[%s5122_s9] sm:$0xff]   ;;  %s3690_s5 = sshll.u32 %s381_s14, 8 }
  0x47   : > { %v5069_v32 = vld [vmem:[#allocation2] sm:$0xff]  ;;  %v5071_v33 = vld [vmem:[#allocation2 + $0x8] sm:$0xff]  ;;  %556 = vst.msk [vmem:[#allocation2 + $0x70] sm:$0xff] %vm541_vm0, %v4730_v3  ;;  %557 = vst.msk [vmem:[#allocation2 + $0x78] sm:$0xff] %vm541_vm0, %v4731_v18  ;;  %s5821_s8 = scalar_lea.vmem [#allocation4], %s3690_s5 }
  0x48   : > { %v5073_v34 = vld [vmem:[#allocation2 + $0x8] sm:$0xfe]  ;;  %v619_v35 = vshrl.u32 %v5069_v32, 16  ;;  %v621_v36 = vshll.u32 %v5069_v32, 16  ;;  %v626_v37 = vshll.u32 %v5071_v33, 16  ;;  %v630_v38 = vshrl.u32 %v5071_v33, 16 }
  0x49   : > { %v5080_v39 = vld [vmem:[#allocation2 + $0x10] sm:$0xff]  ;;  %v1789_v40 = vshrl.u32 %v5073_v34, 16  ;;  %v1792_v41 = vshll.u32 %v5073_v34, 16  ;;  %v5087_v44 = vld [vmem:[#allocation2 + $0x18] sm:$0xff]  ;;  %v5098_v55 = vld [vmem:[#allocation2 + $0x20] sm:$0xff]  ;;  %590 = vst.msk [vmem:[#allocation2 + $0x80] sm:$0xff] %vm541_vm0, %v4732_v26 }
  0x4a   : > { %v1797_v42 = vshrl.u32 %v5080_v39, 16  ;;  %v1800_v43 = vshll.u32 %v5080_v39, 16  ;;  %v623_v46 = vrot.slane %v621_v36, 1  ;;  %v628_v47 = vrot.slane %v626_v37, 1  ;;  %v5107_v2 = vld [vmem:[#allocation2 + $0x28] sm:$0xff]  ;;  %v5116_v8 = vld [vmem:[#allocation2 + $0x30] sm:$0xff] }
  0x4b   : > { %v5091_v48 = vshrl.u32 %v5087_v44, 16  ;;  %v5094_v49 = vshll.u32 %v5087_v44, 16  ;;  %v1791_v51 = vrot.slane %v1789_v40, 1  ;;  %v1794_v52 = vrot.slane %v1792_v41, 2  ;;  %v5161_v30 = vld [vmem:[#allocation2 + $0x38] sm:$0xff]  ;;  %v5169_v40 = vld [vmem:[#allocation2 + $0x40] sm:$0xff] }
  0x4c   : > { %v1799_v53 = vrot.slane %v1797_v42, 1  ;;  %v1802_v54 = vrot.slane %v1800_v43, 2  ;;  %v624_v57 = vor.u32 %v623_v46, %v619_v35  ;;  %v632_v58 = vor.u32 %v630_v38, %v628_v47  ;;  %v5173_v41 = vld [vmem:[%s5026_s13 + $0x10] sm:$0xff]   ;;  %v4735_v46 = vld [vmem:[%s5122_s9 + $0x8] sm:$0xff]   ;;  %s3568_s6 = sshll.u32 %s5821_s8, 4  ;;  %s5890_s6 = int_to_ptr.vmem [resolvable:$true] %s3568_s6 }
  0x4d   : > { %v636_v59 = vrot.slane %v1800_v43, 1  ;;  %v1808_v60 = vrot.slane %v5091_v48, 1  ;;  %v1795_v62 = vor.u32 %v1794_v52, %v1791_v51  ;;  %v1811_v0 = vrot.slane %v5094_v49, 2  ;;  %591 = vst.msk [vmem:[#allocation2 + $0x88] sm:$0xff] %vm541_vm0, %v4735_v46  ;;  %v5227_v26 = vld [vmem:[#allocation2 + $0x50] sm:$0xff]  ;;  %s4740_s18 = scalar_lea.vmem %s5890_s6, 4096 }
  0x4e   : > { %v1803_v63 = vor.u32 %v1802_v54, %v1799_v53  ;;  %v644_v1 = vrot.slane %v5094_v49, 1  ;;  %v629_v4 = vsel %vm617_vm1, %v624_v57, %v628_v47  ;;  %v5114_v7 = vshrl.u32 %v5098_v55, 16  ;;  %p4741_p6 = scmp.ne.s32.totalorder %s5890_s6, %s4740_s18 }
  0x4f   : > { %v637_v5 = vsel %vm617_vm1, %v632_v58, %v636_v59  ;;  %v640_v6 = vor.u32 %v1797_v42, %v636_v59  ;;  %4057 = vmatprep.mubr.msk.bf16.mxu1 %vm541_vm0, %v629_v4  ;;  %v1812_v10 = vor.u32 %v1811_v0, %v1808_v60  ;;  %v5127_v11 = vshll.u32 %v5098_v55, 16  ;;  %v5200_v59 = vld [vmem:[#allocation2 + $0x48] sm:$0xff] }
  0x50   : > { %v1804_v9 = vsel %vm1787_vm2, %v1795_v62, %v1803_v63  ;;  %v648_v12 = vor.u32 %v5091_v48, %v644_v1  ;;  %4058 = vmatmul.mubr.msk.bf16.vlgmr.msra.gmra.mrb[0].mxu1 %vm541_vm0, %v637_v5  ;;  %v1817_v15 = vrot.slane %v5114_v7, 1  ;;  %v5139_v16 = vshrl.u32 %v5107_v2, 16  ;;  %p4742_p8 = pnand %p4741_p6, %p4953_p7 }
  0x51   : > { %4193 = vmatprep.mubr.msk.bf16.mxu0 %vm541_vm0, %v1804_v9  ;;  %v645_v14 = vsel %vm617_vm1, %v640_v6, %v644_v1  ;;  %v5142_v17 = vshll.u32 %v5107_v2, 16  ;;  %4090 = vmatpush3.bf16.msra.mxu1 %v5034_v20  ;;  %v1813_v22 = vsel %vm1787_vm2, %v1803_v63, %v1812_v10  ;;  %v1820_v23 = vrot.slane %v5127_v11, 2 }
  0x52   : > { %4061 = vmatprep.mubr.msk.bf16.mxu1 %vm541_vm0, %v645_v14  ;;  %v652_v24 = vrot.slane %v5127_v11, 1  ;;  %v5151_v25 = vshrl.u32 %v5116_v8, 16  ;;  %4194 = vmatmul.mubr.msk.bf16.vlgmr.msra.gmra.mrb[0].mxu0 %vm541_vm0, %v1813_v22  ;;  %v1826_v27 = vrot.slane %v5139_v16, 1  ;;  %v5159_v29 = vshll.u32 %v5116_v8, 16  ;;  %p4743_p9 = pneg %p4742_p8 }
  0x53   : > { %v1829_v28 = vrot.slane %v5142_v17, 2  ;;  %v660_v20 = vrot.slane %v5142_v17, 1  ;;  %4226 = vmatpush3.bf16.msra.mxu0 %v5043_v21  ;;  %v1821_v31 = vor.u32 %v1820_v23, %v1817_v15  ;;  %v5178_v43 = vshrl.u32 %v5161_v30, 16  ;;  %4123 = vmatprep.subr.bf16.mxu1 %v5173_v41  ;;  %v4738_v15 = vld [vmem:[%s5122_s9 + $0x10] sm:$0xff]   ;;  %v2187_v23 = vld [vmem:[#allocation2 + $0x8] sm:$0xfc] }
  0x54   : > { %v656_v35 = vor.u32 %v5114_v7, %v652_v24  ;;  %v1835_v36 = vrot.slane %v5151_v25, 1  ;;  %v1838_v38 = vrot.slane %v5159_v29, 2  ;;  %4259 = vmatprep.subr.bf16.mxu0 %v5131_v13  ;;  %v653_v21 = vsel %vm617_vm1, %v648_v12, %v652_v24  ;;  %592 = vst.msk [vmem:[#allocation2 + $0x90] sm:$0xff] %vm541_vm0, %v4738_v15 }
  0x55   : > { %v1830_v37 = vor.u32 %v1829_v28, %v1826_v27  ;;  %v1822_v42 = vsel %vm1787_vm2, %v1812_v10, %v1821_v31  ;;  %v5181_v45 = vshll.u32 %v5161_v30, 16  ;;  %v1844_v52 = vrot.slane %v5178_v43, 1 }
  0x56   : > { %4197 = vmatprep.mubr.msk.bf16.mxu0 %vm541_vm0, %v1822_v42  ;;  %v661_v47 = vsel %vm617_vm1, %v656_v35, %v660_v20  ;;  %v1839_v50 = vor.u32 %v1838_v38, %v1835_v36  ;;  %v5190_v54 = vshrl.u32 %v5169_v40, 16  ;;  %v668_v57 = vrot.slane %v5159_v29, 1 }
  0x57   : > { %v1831_v51 = vsel %vm1787_vm2, %v1821_v31, %v1830_v37  ;;  %v1847_v53 = vrot.slane %v5181_v45, 2  ;;  %v5198_v58 = vshll.u32 %v5169_v40, 16  ;;  %v664_v60 = vor.u32 %v5139_v16, %v660_v20  ;;  %v5236_v31 = vld [vmem:[#allocation2 + $0x58] sm:$0xff] }
  0x58   : > { %4062 = vmatmul.mubr.msk.bf16.gmra.mrb[4].mxu1 %vm541_vm0, %v653_v21  ;;  %v1840_v56 = vsel %vm1787_vm2, %v1830_v37, %v1839_v50  ;;  %v1853_v61 = vrot.slane %v5190_v54, 1  ;;  %v672_v62 = vor.u32 %v5151_v25, %v668_v57  ;;  %v676_v63 = vrot.slane %v5181_v45, 1 }
  0x59   : > { %4065 = vmatprep.mubr.msk.bf16.mxu1 %vm541_vm0, %v661_v47  ;;  %v1856_v0 = vrot.slane %v5198_v58, 2  ;;  %v1848_v1 = vor.u32 %v1847_v53, %v1844_v52  ;;  %v5211_v3 = vshrl.u32 %v5200_v59, 16  ;;  %v5214_v4 = vshll.u32 %v5200_v59, 16  ;;  %v5257_v53 = vld [vmem:[#allocation2 + $0x60] sm:$0xff] }
  0x5a   : > { %4198 = vmatmul.mubr.msk.bf16.gmra.mrb[4].mxu0 %vm541_vm0, %v1831_v51  ;;  %v669_v6 = vsel %vm617_vm1, %v664_v60, %v668_v57  ;;  %v677_v9 = vsel %vm617_vm1, %v672_v62, %v676_v63  ;;  %v684_v22 = vrot.slane %v5198_v58, 1  ;;  %v680_v24 = vor.u32 %v5178_v43, %v676_v63 }
  0x5b   : > { %4201 = vmatprep.mubr.msk.bf16.mxu0 %vm541_vm0, %v1840_v56  ;;  %v1857_v5 = vor.u32 %v1856_v0, %v1853_v61  ;;  %v1849_v10 = vsel %vm1787_vm2, %v1839_v50, %v1848_v1  ;;  %v1862_v12 = vrot.slane %v5211_v3, 1  ;;  %v1865_v14 = vrot.slane %v5214_v4, 2  ;;  %v5266_v61 = vld [vmem:[#allocation2 + $0x68] sm:$0xff] }
  0x5c   : > { %v688_v27 = vor.u32 %v5190_v54, %v684_v22  ;;  %v692_v28 = vrot.slane %v5214_v4, 1  ;;  %v2194_v35 = vrot.slane %v2187_v23, 2  ;;  %v2195_v36 = vrot.slane %v5080_v39, 2 }
  0x5d   : > { %v1858_v18 = vsel %vm1787_vm2, %v1848_v1, %v1857_v5  ;;  %v5234_v20 = vor.u32 %v1865_v14, %v1862_v12  ;;  %v5240_v37 = vshll.u32 %v5227_v26, 16  ;;  %v685_v38 = vsel %vm617_vm1, %v680_v24, %v684_v22  ;;  %v5285_v12 = vld [vmem:[#allocation2 + $0x88] sm:$0xff]  ;;  %v5296_v22 = vld [vmem:[%s5026_s13 + $0x38] sm:$0xff]   ;;  %v5300_v24 = vld [vmem:[#allocation2 + $0x70] sm:$0xff] }
  0x5e   : > { %v693_v42 = vsel %vm617_vm1, %v688_v27, %v692_v28  ;;  %v5245_v21 = vshrl.u32 %v5227_v26, 16  ;;  %v5248_v46 = vshll.u32 %v5236_v31, 16  ;;  %v2196_v50 = vsel %vm2193_vm3, %v2194_v35, %v2195_v36 }
  0x5f   : > { %5976 = vst [vmem:[#allocation7_spill] sm:$0xff] %v5234_v20  ;;  %v1867_v47 = vsel %vm1787_vm2, %v1857_v5, %v5234_v20  ;;  %v700_v51 = vrot.slane %v5240_v37, 1  ;;  %v696_v52 = vor.u32 %v5211_v3, %v692_v28  ;;  %v5264_v60 = vrot.slane %v5087_v44, 2 }
  0x60   : > { %4066 = vmatmul.mubr.msk.bf16.gmra.mrb[8].mxu1 %vm541_vm0, %v669_v6  ;;  %v708_v57 = vrot.slane %v5248_v46, 1  ;;  %v2199_v62 = vrot.slane %v5098_v55, 2  ;;  %v5270_v63 = vshll.u32 %v5257_v53, 16  ;;  %v5274_v1 = vshrl.u32 %v5236_v31, 16 }
  0x61   : > { %4069 = vmatprep.mubr.msk.bf16.mxu1 %vm541_vm0, %v677_v9  ;;  %v704_v56 = vor.u32 %v5245_v21, %v700_v51  ;;  %v701_v0 = vsel %vm617_vm1, %v696_v52, %v700_v51  ;;  %v5278_v6 = vshrl.u32 %v5257_v53, 16  ;;  %v5281_v9 = vshll.u32 %v5266_v61, 16 }
  0x62   : > { %4202 = vmatmul.mubr.msk.bf16.gmra.mrb[8].mxu0 %vm541_vm0, %v1849_v10  ;;  %v5283_v10 = vld [vmem:[#allocation2 + $0x80] sm:$0xff]  ;;  %v2198_v14 = vsel %vm2193_vm3, %v2195_v36, %v5264_v60  ;;  %v5292_v15 = vsel %vm2193_vm3, %v5264_v60, %v2199_v62  ;;  %v712_v23 = vor.u32 %v5274_v1, %v708_v57  ;;  %v5961_v28 = vrot.slane %v5285_v12, 2 }
  0x63   : > { %4205 = vmatprep.mubr.msk.bf16.mxu0 %vm541_vm0, %v1858_v18  ;;  %v709_v5 = vsel %vm617_vm1, %v704_v56, %v708_v57  ;;  %5977 = vst [vmem:[#allocation8_spill] sm:$0xff] %v5281_v9  ;;  %v716_v18 = vrot.slane %v5270_v63, 1  ;;  %v5303_v27 = vrot.slane %v5283_v10, 2  ;;  %v724_v36 = vrot.slane %v5281_v9, 1 }
  0x64   : > { %v5323_v51 = vshll.u32 %v5300_v24, 16  ;;  %v5329_v56 = vshrl.u32 %v5266_v61, 16  ;;  %v5332_v57 = vshrl.u32 %v5300_v24, 16  ;;  %v2819_v20 = vrot.slane %v5127_v11, 3 }
  0x65   : > { %v720_v35 = vor.u32 %v5278_v6, %v716_v18  ;;  %v717_v52 = vsel %vm617_vm1, %v712_v23, %v716_v18  ;;  %v2825_v23 = vrot.slane %v5139_v16, 2  ;;  %v2837_v16 = vrot.slane %v5159_v29, 3 }
  0x66   : > { %5978 = vst [vmem:[#allocation9_spill] sm:$0xff] %v5323_v51  ;;  %5979 = vst [vmem:[#allocation10_spill] sm:$0xff] %v5329_v56  ;;  %v728_v11 = vor.u32 %v5329_v56, %v724_v36  ;;  %v2843_v29 = vrot.slane %v5178_v43, 2  ;;  %v2852_v43 = vrot.slane %v5190_v54, 2 }
  0x67   : > { %5980 = vst [vmem:[#allocation11_spill] sm:$0xff] %v5332_v57 }
  0x68   : > { %4070 = vmatmul.mubr.msk.bf16.gmra.mrb[12].mxu1 %vm541_vm0, %v685_v38  ;;  %v2201_v38 = vrot.slane %v5107_v2, 2 }
  0x69   : > { %4073 = vmatprep.mubr.msk.bf16.mxu1 %vm541_vm0, %v693_v42  ;;  %v5313_v42 = vld [vmem:[#allocation2 + $0x78] sm:$0xff] }
  0x6a   : > { %4206 = vmatmul.mubr.msk.bf16.gmra.mrb[12].mxu0 %vm541_vm0, %v1867_v47  ;;  %v5319_v47 = vsel %vm2193_vm3, %v5303_v27, %v5961_v28  ;;  %v2816_v28 = vrot.slane %v5114_v7, 2  ;;  %v2828_v7 = vrot.slane %v5142_v17, 3 }
  0x6b   : > { %4227 = vmatprep.mubr.msk.bf16.mxu0 %vm541_vm0, %v2196_v50  ;;  %v2203_v50 = vrot.slane %v5116_v8, 2 }
  0x6c   : > { %v2820_v9 = vor.u32 %v2819_v20, %v2816_v28  ;;  %v2829_v20 = vor.u32 %v2828_v7, %v2825_v23  ;;  %v2205_v28 = vrot.slane %v5161_v30, 2 }
  0x70   : > { %4074 = vmatmul.mubr.msk.bf16.gmra.mrb[16].mxu1 %vm541_vm0, %v701_v0  ;;  %v2810_v0 = vrot.slane %v5094_v49, 3  ;;  %v5349_v49 = vsel %vm2193_vm3, %v2201_v38, %v2203_v50 }
  0x71   : > { %4077 = vmatprep.mubr.msk.bf16.mxu1 %vm541_vm0, %v709_v5  ;;  %v725_v5 = vsel %vm617_vm1, %v720_v35, %v724_v36  ;;  %v732_v35 = vrot.slane %v5323_v51, 1  ;;  %v2846_v36 = vrot.slane %v5181_v45, 3  ;;  %v5378_v51 = vsel %vm2795_vm4, %v2820_v9, %v2829_v20 }
  0x72   : > { %4228 = vmatmul.mubr.msk.bf16.vlgmr.msra.gmra.mrb[0].mxu0 %vm541_vm0, %v2198_v14  ;;  %v5337_v14 = vshll.u32 %v5313_v42, 16 }
  0x73   : > { %4260 = vmatpush3.bf16.msra.mxu0 %v5131_v13  ;;  %4231 = vmatprep.mubr.msk.bf16.mxu0 %vm541_vm0, %v5292_v15  ;;  %v2807_v13 = vrot.slane %v5091_v48, 2  ;;  %v5342_v48 = vsel %vm2193_vm3, %v2199_v62, %v2201_v38  ;;  %v5355_v62 = vld [vmem:[#allocation2 + $0x80] sm:$0x1]  ;;  %v736_v38 = vor.u32 %v5332_v57, %v732_v35  ;;  %v733_v23 = vsel %vm617_vm1, %v728_v11, %v732_v35 }
  0x74   : > { %4293 = vmatprep.subr.bf16.mxu0 %v5296_v22  ;;  %5981 = vst [vmem:[#allocation12_spill] sm:$0xff] %v5337_v14  ;;  %v5388_v57 = vsel %vm2193_vm3, %v2203_v50, %v2205_v28  ;;  %v2861_v50 = vrot.slane %v5211_v3, 2 }
  0x75   : > { %v5344_v18 = vor.u32 %v2810_v0, %v2807_v13  ;;  %v2834_v13 = vrot.slane %v5151_v25, 2  ;;  %v2207_v0 = vrot.slane %v5169_v40, 2 }
  0x77   : > { %v5365_v17 = vsel %vm2795_vm4, %v5344_v18, %v2820_v9  ;;  %v2838_v25 = vor.u32 %v2837_v16, %v2834_v13  ;;  %v2847_v13 = vor.u32 %v2846_v36, %v2843_v29  ;;  %v2855_v16 = vrot.slane %v5198_v58, 3 }
  0x78   : > { %4078 = vmatmul.mubr.msk.bf16.gmra.mrb[20].mxu1 %vm541_vm0, %v717_v52  ;;  %v740_v52 = vrot.slane %v5337_v14, 1  ;;  %v746_v14 = vshll.u32 %v5355_v62, 16  ;;  %v5395_v9 = vsel %vm2193_vm3, %v2205_v28, %v2207_v0  ;;  %v2211_v28 = vrot.slane %v5227_v26, 2 }
  0x79   : > { %4081 = vmatprep.mubr.msk.bf16.mxu1 %vm541_vm0, %v725_v5  ;;  %v5374_v5 = vshrl.u32 %v5313_v42, 16  ;;  %v5382_v7 = vsel %vm2795_vm4, %v2829_v20, %v2838_v25  ;;  %v5391_v56 = vsel %vm2795_vm4, %v2838_v25, %v2847_v13  ;;  %v2856_v35 = vor.u32 %v2855_v16, %v2852_v43 }
  0x7a   : > { %4232 = vmatmul.mubr.msk.bf16.gmra.mrb[4].mxu0 %vm541_vm0, %v5342_v48  ;;  %v741_v45 = vsel %vm617_vm1, %v736_v38, %v740_v52  ;;  %v748_v11 = vrot.slane %v746_v14, 1  ;;  %v2864_v38 = vrot.slane %v5214_v4, 3  ;;  %v2209_v20 = vrot.slane %v5200_v59, 2 }
  0x7b   : > { %4235 = vmatprep.mubr.msk.bf16.mxu0 %vm541_vm0, %v5349_v49  ;;  %v744_v54 = vor.u32 %v5374_v5, %v740_v52  ;;  %v5402_v58 = vsel %vm2795_vm4, %v2847_v13, %v2856_v35  ;;  %v2213_v29 = vrot.slane %v5236_v31, 2  ;;  %v2215_v36 = vrot.slane %v5257_v53, 2 }
  0x7c   : > { %v5410_v52 = vor.u32 %v2864_v38, %v2861_v50  ;;  %v2210_v3 = vsel %vm2193_vm3, %v2207_v0, %v2209_v20  ;;  %v5420_v4 = vsel %vm2193_vm3, %v2209_v20, %v2211_v28  ;;  %v2219_v43 = vrot.slane %v5300_v24, 2  ;;  %v2474_v50 = vld [vmem:[#allocation2 + $0x10] sm:$0xfc] }
  0x7d   : > { %v749_v14 = vsel %vm617_vm1, %v744_v54, %v748_v11  ;;  %v2214_v0 = vsel %vm2193_vm3, %v2211_v28, %v2213_v29  ;;  %v5436_v13 = vsel %vm2193_vm3, %v2213_v29, %v2215_v36  ;;  %v2221_v16 = vrot.slane %v5313_v42, 2  ;;  %v5463_v11 = vld [vmem:[#allocation2 + $0x88] sm:$0x3] }
  0x7e   : > { %v5415_v25 = vsel %vm2795_vm4, %v2856_v35, %v5410_v52  ;;  %v2225_v38 = vrot.slane %v5463_v11, 2  ;;  %v2511_v20 = vrot.slane %v2474_v50, 2  ;;  %v5484_v29 = vld [vmem:[%s5026_s13 + $0x40] sm:$0xff]  }
  0x7f   : > { %v2222_v35 = vsel %vm2193_vm3, %v2219_v43, %v2221_v16  ;;  %v5461_v54 = vsel %vm2193_vm3, %v2221_v16, %v5303_v27 }
  0x80   : > { %4082 = vmatmul.mubr.msk.bf16.gmra.mrb[24].mxu1 %vm541_vm0, %v733_v23  ;;  %v5430_v23 = vld [vmem:[%s5026_s13 + $0x18] sm:$0xff]   ;;  %v2226_v28 = vsel %vm2193_vm3, %v5303_v27, %v2225_v38  ;;  %s409_s13 = scalar_select %p408_p5, %s4838_s21, 1 }
  0x81   : > { %4085 = vmatprep.mubr.msk.bf16.mxu1 %vm541_vm0, %v741_v45 }
  0x82   : > { %4236 = vmatmul.mubr.msk.bf16.gmra.mrb[8].mxu0 %vm541_vm0, %v5388_v57  ;;  %s410_s26 = scalar_lea.vmem %s5959_s3, %s409_s13  ;;  %s5886_s13 = scalar_lea.hbm %s5960_s4, %s3889_s20 }
  0x83   : > { %4239 = vmatprep.mubr.msk.bf16.mxu0 %vm541_vm0, %v5395_v9 }
  0x88   : > { %4086 = vmatmul.mubr.msk.bf16.gmra.mrb[28].mxu1 %vm541_vm0, %v749_v14  ;;  %v2513_v14 = vsel %vm2193_vm3, %v2511_v20, %v5264_v60  ;;  %v1164_v60 = vld [vmem:[#allocation2] sm:$0xfe]  ;;  %v2925_v20 = vshll.u32 %v5283_v10, 16 }
  0x89   : > { %4091 = vmatprep.mubr.msk.bf16.mxu1 %vm541_vm0, %v5069_v32  ;;  %v2217_v32 = vrot.slane %v5266_v61, 2 }
  0x8a   : > { %4240 = vmatmul.mubr.msk.bf16.gmra.mrb[12].mxu0 %vm541_vm0, %v2210_v3 }
  0x8b   : > { %4243 = vmatprep.mubr.msk.bf16.mxu0 %vm541_vm0, %v5420_v4  ;;  %v2218_v45 = vsel %vm2193_vm3, %v2215_v36, %v2217_v32  ;;  %v1197_v36 = vrot.slane %v5116_v8, 1 }
  0x90   : > { %4092 = vmatmul.mubr.msk.bf16.vlgmr.msra.gmra.mrb[0].mxu1 %vm541_vm0, %v5071_v33 }
  0x91   : > { %4124 = vmatpush3.bf16.msra.mxu1 %v5173_v41  ;;  %4095 = vmatprep.mubr.msk.bf16.mxu1 %vm541_vm0, %v5080_v39  ;;  %v2220_v41 = vsel %vm2193_vm3, %v2217_v32, %v2219_v43 }
  0x92   : > { %4244 = vmatmul.mubr.msk.bf16.gmra.mrb[16].mxu0 %vm541_vm0, %v2214_v0  ;;  %4157 = vmatprep.subr.bf16.mxu1 %v5430_v23 }
  0x93   : > { %4247 = vmatprep.mubr.msk.bf16.mxu0 %vm541_vm0, %v5436_v13 }
  0x98   : > { %4096 = vmatmul.mubr.msk.bf16.gmra.mrb[4].mxu1 %vm541_vm0, %v5087_v44 }
  0x99   : > { %4099 = vmatprep.mubr.msk.bf16.mxu1 %vm541_vm0, %v5098_v55 }
  0x9a   : > { %4248 = vmatmul.mubr.msk.bf16.gmra.mrb[20].mxu0 %vm541_vm0, %v2218_v45 }
  0x9b   : > { %4251 = vmatprep.mubr.msk.bf16.mxu0 %vm541_vm0, %v2220_v41 }
  0xa0   : > { %4100 = vmatmul.mubr.msk.bf16.gmra.mrb[8].mxu1 %vm541_vm0, %v5107_v2 }
  0xa1   : > { %4103 = vmatprep.mubr.msk.bf16.mxu1 %vm541_vm0, %v5116_v8 }
  0xa2   : > { %4252 = vmatmul.mubr.msk.bf16.gmra.mrb[24].mxu0 %vm541_vm0, %v2222_v35 }
  0xa3   : > { %4255 = vmatprep.mubr.msk.bf16.mxu0 %vm541_vm0, %v5461_v54 }
  0xa8   : > { %4104 = vmatmul.mubr.msk.bf16.gmra.mrb[12].mxu1 %vm541_vm0, %v5161_v30 }
  0xa9   : > { %4107 = vmatprep.mubr.msk.bf16.mxu1 %vm541_vm0, %v5169_v40 }
  0xaa   : > { %4256 = vmatmul.mubr.msk.bf16.gmra.mrb[28].mxu0 %vm541_vm0, %v2226_v28 }
  0xab   : > { %4261 = vmatprep.mubr.msk.bf16.mxu0 %vm541_vm0, %v2513_v14  ;;  %v1928_v14 = vrot.slane %v2925_v20, 2 }
  0xb0   : > { %4108 = vmatmul.mubr.msk.bf16.gmra.mrb[16].mxu1 %vm541_vm0, %v5200_v59 }
  0xb1   : > { %4111 = vmatprep.mubr.msk.bf16.mxu1 %vm541_vm0, %v5227_v26 }
  0xb2   : > { %4262 = vmatmul.mubr.msk.bf16.vlgmr.msra.gmra.mrb[0].mxu0 %vm541_vm0, %v5292_v15  ;;  %v1186_v15 = vrot.slane %v1164_v60, 1 }
  0xb3   : > { %4294 = vmatpush3.bf16.msra.mxu0 %v5296_v22  ;;  %4265 = vmatprep.mubr.msk.bf16.mxu0 %vm541_vm0, %v5342_v48  ;;  %v1187_v22 = vrot.slane %v5071_v33, 1  ;;  %v1191_v48 = vrot.slane %v5087_v44, 1 }
  0xb4   : > { %4327 = vmatprep.subr.bf16.mxu0 %v5484_v29 }
  0xb5   : > { %v1188_v27 = vsel %vm1185_vm5, %v1186_v15, %v1187_v22 }
  0xb8   : > { %4112 = vmatmul.mubr.msk.bf16.gmra.mrb[20].mxu1 %vm541_vm0, %v5236_v31 }
  0xb9   : > { %4115 = vmatprep.mubr.msk.bf16.mxu1 %vm541_vm0, %v5257_v53 }
  0xba   : > { %4266 = vmatmul.mubr.msk.bf16.gmra.mrb[4].mxu0 %vm541_vm0, %v5349_v49 }
  0xbb   : > { %4269 = vmatprep.mubr.msk.bf16.mxu0 %vm541_vm0, %v5388_v57  ;;  %v5515_v57 = vrot.slane %v5080_v39, 1  ;;  %v1193_v39 = vrot.slane %v5098_v55, 1 }
  0xbd   : > { %v1190_v33 = vsel %vm1185_vm5, %v1187_v22, %v5515_v57  ;;  %v5525_v49 = vsel %vm1185_vm5, %v5515_v57, %v1191_v48 }
  0xc0   : > { %4116 = vmatmul.mubr.msk.bf16.gmra.mrb[24].mxu1 %vm541_vm0, %v5266_v61 }
  0xc1   : > { %4119 = vmatprep.mubr.msk.bf16.mxu1 %vm541_vm0, %v5300_v24 }
  0xc2   : > { %4270 = vmatmul.mubr.msk.bf16.gmra.mrb[8].mxu0 %vm541_vm0, %v5395_v9  ;;  %v1195_v9 = vrot.slane %v5107_v2, 1 }
  0xc3   : > { %4273 = vmatprep.mubr.msk.bf16.mxu0 %vm541_vm0, %v2210_v3  ;;  %v5538_v3 = vsel %vm1185_vm5, %v1191_v48, %v1193_v39  ;;  %v5982_v48 = vrot.slane %v5285_v12, 2 }
  0xc4   : > { %v5552_v32 = vsel %vm1185_vm5, %v1195_v9, %v1197_v36 }
  0xc8   : > { %4120 = vmatmul.mubr.msk.bf16.gmra.mrb[28].mxu1 %vm541_vm0, %v5313_v42 }
  0xc9   : > { %4125 = vmatprep.mubr.msk.bf16.mxu1 %vm541_vm0, %v1188_v27 }
  0xca   : > { %4274 = vmatmul.mubr.msk.bf16.gmra.mrb[12].mxu0 %vm541_vm0, %v5420_v4  ;;  %v5541_v4 = vsel %vm1185_vm5, %v1193_v39, %v1195_v9  ;;  %v1205_v39 = vrot.slane %v5227_v26, 1  ;;  %v1207_v9 = vrot.slane %v5236_v31, 1 }
  0xcb   : > { %4277 = vmatprep.mubr.msk.bf16.mxu0 %vm541_vm0, %v2214_v0  ;;  %v2797_v0 = vshrl.u32 %v2474_v50, 16 }
  0xcd   : > { %v2799_v16 = vrot.slane %v2797_v0, 2  ;;  %v1211_v0 = vrot.slane %v5266_v61, 1 }
  0xd0   : > { %4126 = vmatmul.mubr.msk.bf16.vlgmr.msra.gmra.mrb[0].mxu1 %vm541_vm0, %v1190_v33 }
  0xd1   : > { %4158 = vmatpush3.bf16.msra.mxu1 %v5430_v23  ;;  %4129 = vmatprep.mubr.msk.bf16.mxu1 %vm541_vm0, %v5525_v49  ;;  %v1199_v23 = vrot.slane %v5161_v30, 1 }
  0xd2   : > { %4278 = vmatmul.mubr.msk.bf16.gmra.mrb[16].mxu0 %vm541_vm0, %v5436_v13  ;;  %4361 = vmatprep.subr.bf16.mxu1 %v5031_v19  ;;  %v2800_v13 = vshll.u32 %v2474_v50, 16  ;;  %v1203_v50 = vrot.slane %v5200_v59, 1 }
  0xd3   : > { %4281 = vmatprep.mubr.msk.bf16.mxu0 %vm541_vm0, %v2218_v45  ;;  %v5555_v43 = vsel %vm1185_vm5, %v1197_v36, %v1199_v23  ;;  %v2490_v45 = vld [vmem:[#allocation2 + $0x90] sm:$0x3] }
  0xd4   : > { %v2802_v38 = vrot.slane %v2800_v13, 3  ;;  %v2542_v60 = vrot.slane %v2490_v45, 2  ;;  %v5595_v36 = vsel %vm1185_vm5, %v1203_v50, %v1205_v39 }
  0xd6   : > { %v2803_v15 = vor.u32 %v2802_v38, %v2799_v16  ;;  %v2543_v33 = vsel %vm2193_vm3, %v5982_v48, %v2542_v60  ;;  %v2870_v38 = vrot.slane %v5245_v21, 2 }
  0xd8   : > { %4130 = vmatmul.mubr.msk.bf16.gmra.mrb[4].mxu1 %vm541_vm0, %v5538_v3 }
  0xd9   : > { %4133 = vmatprep.mubr.msk.bf16.mxu1 %vm541_vm0, %v5541_v4 }
  0xda   : > { %4282 = vmatmul.mubr.msk.bf16.gmra.mrb[20].mxu0 %vm541_vm0, %v2220_v41  ;;  %v2922_v41 = vshrl.u32 %v5283_v10, 16 }
  0xdb   : > { %4285 = vmatprep.mubr.msk.bf16.mxu0 %vm541_vm0, %v2222_v35  ;;  %v1201_v35 = vrot.slane %v5169_v40, 1 }
  0xdc   : > { %v1925_v28 = vrot.slane %v2922_v41, 1 }
  0xdd   : > { %v5576_v27 = vsel %vm1185_vm5, %v1199_v23, %v1201_v35  ;;  %v5598_v23 = vsel %vm1185_vm5, %v1205_v39, %v1207_v9  ;;  %v5984_v39 = vld [vmem:[#allocation8_spill] sm:$0xff] }
  0xde   : > { %v5573_v22 = vor.u32 %v1928_v14, %v1925_v28  ;;  %v1503_v28 = vrot.slane %v5073_v34, 1 }
  0xe0   : > { %4134 = vmatmul.mubr.msk.bf16.gmra.mrb[8].mxu1 %vm541_vm0, %v5552_v32  ;;  %v1505_v48 = vsel %vm1185_vm5, %v1503_v28, %v5515_v57 }
  0xe1   : > { %4137 = vmatprep.mubr.msk.bf16.mxu1 %vm541_vm0, %v5555_v43 }
  0xe2   : > { %4286 = vmatmul.mubr.msk.bf16.gmra.mrb[24].mxu0 %vm541_vm0, %v5461_v54  ;;  %v5579_v54 = vsel %vm1185_vm5, %v1201_v35, %v1203_v50  ;;  %v2873_v35 = vrot.slane %v5240_v37, 3  ;;  %v2882_v50 = vrot.slane %v5248_v46, 3 }
  0xe3   : > { %4289 = vmatprep.mubr.msk.bf16.mxu0 %vm541_vm0, %v5319_v47  ;;  %v2812_v47 = vsel %vm2795_vm4, %v2803_v15, %v5344_v18  ;;  %v1209_v18 = vrot.slane %v5257_v53, 1 }
  0xe4   : > { %v2874_v14 = vor.u32 %v2873_v35, %v2870_v38  ;;  %v5986_v38 = vld [vmem:[#allocation9_spill] sm:$0xff] }
  0xe5   : > { %v5612_v13 = vsel %vm1185_vm5, %v1207_v9, %v1209_v18  ;;  %v5615_v45 = vsel %vm1185_vm5, %v1209_v18, %v1211_v0  ;;  %v2900_v9 = vrot.slane %v5984_v39, 3  ;;  %v2909_v35 = vrot.slane %v5986_v38, 3 }
  0xe8   : > { %4138 = vmatmul.mubr.msk.bf16.gmra.mrb[12].mxu1 %vm541_vm0, %v5576_v27 }
  0xe9   : > { %4141 = vmatprep.mubr.msk.bf16.mxu1 %vm541_vm0, %v5579_v54 }
  0xea   : > { %4290 = vmatmul.mubr.msk.bf16.gmra.mrb[28].mxu0 %vm541_vm0, %v2543_v33  ;;  %v2875_v33 = vsel %vm2795_vm4, %v5410_v52, %v2874_v14 }
  0xeb   : > { %4295 = vmatprep.mubr.msk.bf16.mxu0 %vm541_vm0, %v2812_v47 }
  0xf0   : > { %4142 = vmatmul.mubr.msk.bf16.gmra.mrb[16].mxu1 %vm541_vm0, %v5595_v36 }
  0xf1   : > { %4145 = vmatprep.mubr.msk.bf16.mxu1 %vm541_vm0, %v5598_v23 }
  0xf2   : > { %4296 = vmatmul.mubr.msk.bf16.vlgmr.msra.gmra.mrb[0].mxu0 %vm541_vm0, %v5365_v17  ;;  %v1213_v17 = vrot.slane %v5300_v24, 1 }
  0xf3   : > { %4328 = vmatpush3.bf16.msra.mxu0 %v5484_v29  ;;  %4299 = vmatprep.mubr.msk.bf16.mxu0 %vm541_vm0, %v5378_v51  ;;  %v5625_v29 = vrot.slane %v5313_v42, 1 }
  0xf4   : > { %v5630_v51 = vsel %vm1185_vm5, %v1211_v0, %v1213_v17  ;;  %v5985_v0 = vld [vmem:[#allocation11_spill] sm:$0xff] }
  0xf5   : > { %v5634_v16 = vsel %vm1185_vm5, %v1213_v17, %v5625_v29  ;;  %v2906_v17 = vrot.slane %v5985_v0, 2 }
  0xf8   : > { %4146 = vmatmul.mubr.msk.bf16.gmra.mrb[20].mxu1 %vm541_vm0, %v5612_v13 }
  0xf9   : > { %4149 = vmatprep.mubr.msk.bf16.mxu1 %vm541_vm0, %v5615_v45 }
  0xfa   : > { %4300 = vmatmul.mubr.msk.bf16.gmra.mrb[4].mxu0 %vm541_vm0, %v5382_v7  ;;  %v2879_v7 = vrot.slane %v5274_v1, 2 }
  0xfb   : > { %4303 = vmatprep.mubr.msk.bf16.mxu0 %vm541_vm0, %v5391_v56  ;;  %v1217_v56 = vrot.slane %v5355_v62, 1  ;;  %v2888_v62 = vrot.slane %v5278_v6, 2 }
  0xfc   : > { %v2883_v60 = vor.u32 %v2882_v50, %v2879_v7  ;;  %v2915_v50 = vrot.slane %v5374_v5, 2 }
  0xfd   : > { %v1218_v15 = vsel %vm1185_vm5, %v5625_v29, %v1217_v56  ;;  %v5987_v56 = vld [vmem:[#allocation12_spill] sm:$0xff] }
  0xfe   : > { %v2884_v34 = vsel %vm2795_vm4, %v2874_v14, %v2883_v60  ;;  %v2918_v28 = vrot.slane %v5987_v56, 3  ;;  %v2910_v14 = vor.u32 %v2909_v35, %v2906_v17 }
 0x100   : > { %4150 = vmatmul.mubr.msk.bf16.gmra.mrb[24].mxu1 %vm541_vm0, %v5630_v51 }
 0x101   : > { %4153 = vmatprep.mubr.msk.bf16.mxu1 %vm541_vm0, %v5634_v16 }
 0x102   : > { %4304 = vmatmul.mubr.msk.bf16.gmra.mrb[8].mxu0 %vm541_vm0, %v5402_v58  ;;  %v2891_v58 = vrot.slane %v5270_v63, 3 }
 0x103   : > { %4307 = vmatprep.mubr.msk.bf16.mxu0 %vm541_vm0, %v5415_v25  ;;  %v5983_v25 = vld [vmem:[#allocation10_spill] sm:$0xff] }
 0x104   : > { %v2897_v47 = vrot.slane %v5983_v25, 2  ;;  %v2892_v57 = vor.u32 %v2891_v58, %v2888_v62 }
 0x106   : > { %v2901_v52 = vor.u32 %v2900_v9, %v2897_v47  ;;  %v2893_v18 = vsel %vm2795_vm4, %v2883_v60, %v2892_v57  ;;  %v2919_v60 = vor.u32 %v2918_v28, %v2915_v50  ;;  %v3207_v28 = vrot.slane %v5107_v2, 3 }
 0x108   : > { %4154 = vmatmul.mubr.msk.bf16.gmra.mrb[28].mxu1 %vm541_vm0, %v1218_v15  ;;  %v2902_v7 = vsel %vm2795_vm4, %v2892_v57, %v2901_v52  ;;  %v2931_v15 = vshrl.u32 %v5285_v12, 16 }
 0x109   : > { %4159 = vmatprep.mubr.msk.bf16.mxu1 %vm541_vm0, %v1505_v48  ;;  %v2911_v48 = vsel %vm2795_vm4, %v2901_v52, %v2910_v14 }
 0x10a   : > { %4308 = vmatmul.mubr.msk.bf16.gmra.mrb[12].mxu0 %vm541_vm0, %v2875_v33  ;;  %v2924_v33 = vrot.slane %v2922_v41, 2  ;;  %v2933_v62 = vrot.slane %v2931_v15, 2  ;;  %v1874_v15 = vrot.slane %v5240_v37, 2 }
 0x10b   : > { %4311 = vmatprep.mubr.msk.bf16.mxu0 %vm541_vm0, %v2884_v34  ;;  %v5688_v34 = vld [vmem:[#allocation2 + $0x90] sm:$0x7] }
 0x10c   : > { %v2940_v47 = vshrl.u32 %v5688_v34, 16 }
 0x10e   : > { %v2942_v57 = vrot.slane %v2940_v47, 2  ;;  %v1901_v47 = vrot.slane %v5984_v39, 2  ;;  %v3225_v39 = vrot.slane %v5300_v24, 3  ;;  %v1932_v24 = vshrl.u32 %v5463_v11, 16 }
 0x110   : > { %4160 = vmatmul.mubr.msk.bf16.vlgmr.msra.gmra.mrb[0].mxu1 %vm541_vm0, %v5525_v49  ;;  %v2934_v49 = vshll.u32 %v5285_v12, 16 }
 0x111   : > { %4362 = vmatpush3.bf16.msra.mxu1 %v5031_v19  ;;  %4163 = vmatprep.mubr.msk.bf16.mxu1 %vm541_vm0, %v5538_v3  ;;  %v2927_v19 = vrot.slane %v2925_v20, 3  ;;  %v2920_v3 = vsel %vm2795_vm4, %v2910_v14, %v2919_v60  ;;  %v2943_v20 = vshll.u32 %v5688_v34, 16 }
 0x112   : > { %4312 = vmatmul.mubr.msk.bf16.gmra.mrb[16].mxu0 %vm541_vm0, %v2893_v18  ;;  %v2936_v58 = vrot.slane %v2934_v49, 3 }
 0x113   : > { %4315 = vmatprep.mubr.msk.bf16.mxu0 %vm541_vm0, %v2902_v7  ;;  %v2928_v41 = vor.u32 %v2927_v19, %v2924_v33  ;;  %v2945_v52 = vrot.slane %v2943_v20, 3  ;;  %v3203_v7 = vrot.slane %v5087_v44, 3  ;;  %v5988_v33 = vld [vmem:[#allocation7_spill] sm:$0xff] }
 0x114   : > { %v2937_v9 = vor.u32 %v2936_v58, %v2933_v62  ;;  %v1892_v62 = vrot.slane %v5270_v63, 2 }
 0x115   : > { %v2946_v17 = vor.u32 %v2945_v52, %v2942_v57  ;;  %v1916_v52 = vrot.slane %v5374_v5, 1  ;;  %v3229_v5 = vrot.slane %v5283_v10, 3 }
 0x116   : > { %v2938_v18 = vsel %vm2795_vm4, %v2928_v41, %v2937_v9 }
 0x117   : > { %v2947_v50 = vsel %vm2795_vm4, %v2937_v9, %v2946_v17  ;;  %v1907_v9 = vrot.slane %v5985_v0, 1  ;;  %v3227_v0 = vrot.slane %v5313_v42, 3  ;;  %v1935_v42 = vshll.u32 %v5463_v11, 16 }
 0x118   : > { %4164 = vmatmul.mubr.msk.bf16.gmra.mrb[4].mxu1 %vm541_vm0, %v5541_v4  ;;  %v2929_v4 = vsel %vm2795_vm4, %v2919_v60, %v2928_v41  ;;  %v1482_v60 = vld [vmem:[#allocation2 + $0x88] sm:$0x1]  ;;  %v1898_v41 = vrot.slane %v5983_v25, 1 }
 0x119   : > { %4167 = vmatprep.mubr.msk.bf16.mxu1 %vm541_vm0, %v5552_v32  ;;  %v3195_v32 = vld [vmem:[#allocation2 + $0x10] sm:$0xf8] }
 0x11a   : > { %4316 = vmatmul.mubr.msk.bf16.gmra.mrb[20].mxu0 %vm541_vm0, %v2911_v48  ;;  %v3202_v35 = vrot.slane %v3195_v32, 3  ;;  %v1880_v48 = vrot.slane %v5274_v1, 1 }
 0x11b   : > { %4319 = vmatprep.mubr.msk.bf16.mxu0 %vm541_vm0, %v2920_v3  ;;  %v1889_v3 = vrot.slane %v5278_v6, 1  ;;  %v3223_v6 = vrot.slane %v5266_v61, 3  ;;  %v1902_v61 = vor.u32 %v1901_v47, %v1898_v41 }
 0x11d   : > { %v1893_v1 = vor.u32 %v1892_v62, %v1889_v3  ;;  %v3226_v17 = vsel %vm3201_vm6, %v3223_v6, %v3225_v39 }
 0x120   : > { %4168 = vmatmul.mubr.msk.bf16.gmra.mrb[8].mxu1 %vm541_vm0, %v5555_v43  ;;  %v3204_v43 = vsel %vm3201_vm6, %v3202_v35, %v3203_v7  ;;  %v3228_v35 = vsel %vm3201_vm6, %v3225_v39, %v3227_v0 }
 0x121   : > { %4171 = vmatprep.mubr.msk.bf16.mxu1 %vm541_vm0, %v5576_v27  ;;  %v3205_v27 = vrot.slane %v5098_v55, 3  ;;  %v3211_v55 = vrot.slane %v5161_v30, 3  ;;  %v3215_v30 = vrot.slane %v5200_v59, 3 }
 0x122   : > { %4320 = vmatmul.mubr.msk.bf16.gmra.mrb[24].mxu0 %vm541_vm0, %v2929_v4  ;;  %v1910_v4 = vrot.slane %v5986_v38, 2  ;;  %v1903_v38 = vsel %vm1787_vm2, %v1893_v1, %v1902_v61 }
 0x123   : > { %4323 = vmatprep.mubr.msk.bf16.mxu0 %vm541_vm0, %v2938_v18  ;;  %v3206_v44 = vsel %vm3201_vm6, %v3203_v7, %v3205_v27  ;;  %v1919_v18 = vrot.slane %v5987_v56, 2  ;;  %v3231_v56 = vrot.slane %v5285_v12, 3 }
 0x124   : > { %v1911_v25 = vor.u32 %v1910_v4, %v1907_v9 }
 0x125   : > { %v1920_v7 = vor.u32 %v1919_v18, %v1916_v52  ;;  %v3232_v11 = vsel %vm3201_vm6, %v3229_v5, %v3231_v56 }
 0x126   : > { %v1912_v32 = vsel %vm1787_vm2, %v1902_v61, %v1911_v25 }
 0x128   : > { %4172 = vmatmul.mubr.msk.bf16.gmra.mrb[12].mxu1 %vm541_vm0, %v5579_v54  ;;  %v3208_v54 = vsel %vm3201_vm6, %v3205_v27, %v3207_v28  ;;  %v1937_v27 = vrot.slane %v1935_v42, 2 }
 0x129   : > { %4175 = vmatprep.mubr.msk.bf16.mxu1 %vm541_vm0, %v5595_v36  ;;  %v3209_v36 = vrot.slane %v5116_v8, 3  ;;  %v3213_v8 = vrot.slane %v5169_v40, 3  ;;  %v1534_v40 = vrot.slane %v1482_v60, 1 }
 0x12a   : > { %4324 = vmatmul.mubr.msk.bf16.gmra.mrb[28].mxu0 %vm541_vm0, %v2947_v50  ;;  %v1921_v50 = vsel %vm1787_vm2, %v1911_v25, %v1920_v7 }
 0x12b   : > { %4329 = vmatprep.mubr.msk.bf16.mxu0 %vm541_vm0, %v3204_v43  ;;  %v3210_v2 = vsel %vm3201_vm6, %v3207_v28, %v3209_v36  ;;  %v3216_v49 = vsel %vm3201_vm6, %v3213_v8, %v3215_v30  ;;  %v1934_v43 = vrot.slane %v1932_v24, 1  ;;  %v1930_v28 = vsel %vm1787_vm2, %v1920_v7, %v5573_v22 }
 0x130   : > { %4176 = vmatmul.mubr.msk.bf16.gmra.mrb[16].mxu1 %vm541_vm0, %v5598_v23  ;;  %v3212_v23 = vsel %vm3201_vm6, %v3209_v36, %v3211_v55 }
 0x131   : > { %4179 = vmatprep.mubr.msk.bf16.mxu1 %vm541_vm0, %v5612_v13  ;;  %v1532_v13 = vrot.slane %v5283_v10, 1  ;;  %v3233_v10 = vrot.slane %v5688_v34, 3 }
 0x132   : > { %4330 = vmatmul.mubr.msk.bf16.vlgmr.msra.gmra.mrb[0].mxu0 %vm541_vm0, %v3206_v44  ;;  %v3230_v44 = vsel %vm3201_vm6, %v3227_v0, %v3229_v5 }
 0x133   : > { %4333 = vmatprep.mubr.msk.bf16.mxu0 %vm541_vm0, %v3208_v54  ;;  %v1533_v14 = vsel %vm1185_vm5, %v5625_v29, %v1532_v13  ;;  %v3217_v29 = vrot.slane %v5227_v26, 3  ;;  %v1535_v37 = vsel %vm1185_vm5, %v1532_v13, %v1534_v40  ;;  %v1938_v54 = vor.u32 %v1937_v27, %v1934_v43 }
 0x134   : > { %v3234_v36 = vsel %vm3201_vm6, %v3231_v56, %v3233_v10 }
 0x135   : > { %v3218_v58 = vsel %vm3201_vm6, %v3215_v30, %v3217_v29  ;;  %v1939_v12 = vsel %vm1787_vm2, %v5573_v22, %v1938_v54 }
 0x138   : > { %4180 = vmatmul.mubr.msk.bf16.gmra.mrb[20].mxu1 %vm541_vm0, %v5615_v45  ;;  %v1871_v45 = vrot.slane %v5245_v21, 1  ;;  %v3219_v21 = vrot.slane %v5236_v31, 3 }
 0x139   : > { %4183 = vmatprep.mubr.msk.bf16.mxu1 %vm541_vm0, %v5630_v51  ;;  %v3214_v51 = vsel %vm3201_vm6, %v3211_v55, %v3213_v8 }
 0x13a   : > { %4334 = vmatmul.mubr.msk.bf16.gmra.mrb[4].mxu0 %vm541_vm0, %v3210_v2  ;;  %v1875_v59 = vor.u32 %v1874_v15, %v1871_v45  ;;  %v3220_v26 = vsel %vm3201_vm6, %v3217_v29, %v3219_v21  ;;  %v5817_v29 = vld [vmem:[%s410_s26] ss:$0 sm:$0xff]  ;;  %s4852_s26 = smov [#allocation4]  }
 0x13b   : > { %4337 = vmatprep.mubr.msk.bf16.mxu0 %vm541_vm0, %v3212_v23  ;;  %s4744_s5 = sshll.u32 %s4852_s26, 4  ;;  %s4745_s5 = int_to_ptr.vmem [resolvable:$false] %s4744_s5 }
 0x13c   : > { %v1876_v19 = vsel %vm1787_vm2, %v5988_v33, %v1875_v59  ;;  %s4746_s29 = scalar_lea.vmem %s4745_s5, 8192  ;;  %p4747_p10 = scmp.lt.s32.totalorder %s5890_s6, %s4745_s5 }
 0x13d   : > { %p4748_p11 = scmp.lt.s32.totalorder %s4746_s29, %s4740_s18 }
 0x13f   : > { %p4749_p13 = por %p4748_p11, %p4747_p10 }
 0x140   : > { %4184 = vmatmul.mubr.msk.bf16.gmra.mrb[24].mxu1 %vm541_vm0, %v5634_v16  ;;  %v1883_v16 = vrot.slane %v5248_v46, 2  ;;  %v3221_v46 = vrot.slane %v5257_v53, 3 }
 0x141   : > { %4187 = vmatprep.mubr.msk.bf16.mxu1 %vm541_vm0, %v1533_v14  ;;  %p4750_p0 = pnand %p4749_p13, %p4743_p9 }
 0x142   : > { %4338 = vmatmul.mubr.msk.bf16.gmra.mrb[8].mxu0 %vm541_vm0, %v3214_v51  ;;  %v1884_v31 = vor.u32 %v1883_v16, %v1880_v48  ;;  %v3222_v57 = vsel %vm3201_vm6, %v3219_v21, %v3221_v46  ;;  %v3224_v53 = vsel %vm3201_vm6, %v3221_v46, %v3223_v6 }
 0x143   : > { %4341 = vmatprep.mubr.msk.bf16.mxu0 %vm541_vm0, %v3216_v49 }
 0x144   : > { %v1885_v63 = vsel %vm1787_vm2, %v1875_v59, %v1884_v31  ;;  %v1894_v20 = vsel %vm1787_vm2, %v1884_v31, %v1893_v1 }
 0x148   : > { %4188 = vmatmul.mubr.msk.bf16.gmra.mrb[28].mxu1 %vm541_vm0, %v1535_v37 }
 0x149   : > { %4209 = vmatprep.mubr.msk.bf16.mxu1 %vm541_vm0, %v1876_v19 }
 0x14a   : > { %4342 = vmatmul.mubr.msk.bf16.gmra.mrb[12].mxu0 %vm541_vm0, %v3218_v58 }
 0x14b   : > { %4345 = vmatprep.mubr.msk.bf16.mxu0 %vm541_vm0, %v3220_v26 }
 0x150   : > { %4210 = vmatmul.mubr.msk.bf16.vlgmr.msra.gmra.mrb[16].mxu1 %vm541_vm0, %v1885_v63 }
 0x151   : > { %4213 = vmatprep.mubr.msk.bf16.mxu1 %vm541_vm0, %v1894_v20 }
 0x152   : > { %4346 = vmatmul.mubr.msk.bf16.gmra.mrb[16].mxu0 %vm541_vm0, %v3222_v57 }
 0x153   : > { %4349 = vmatprep.mubr.msk.bf16.mxu0 %vm541_vm0, %v3224_v53 }
 0x158   : > { %4214 = vmatmul.mubr.msk.bf16.gmra.mrb[20].mxu1 %vm541_vm0, %v1903_v38 }
 0x159   : > { %4217 = vmatprep.mubr.msk.bf16.mxu1 %vm541_vm0, %v1912_v32 }
 0x15a   : > { %4350 = vmatmul.mubr.msk.bf16.gmra.mrb[20].mxu0 %vm541_vm0, %v3226_v17 }
 0x15b   : > { %4353 = vmatprep.mubr.msk.bf16.mxu0 %vm541_vm0, %v3228_v35 }
 0x160   : > { %4218 = vmatmul.mubr.msk.bf16.gmra.mrb[24].mxu1 %vm541_vm0, %v1921_v50 }
 0x161   : > { %4221 = vmatprep.mubr.msk.bf16.mxu1 %vm541_vm0, %v1930_v28 }
 0x162   : > { %4354 = vmatmul.mubr.msk.bf16.gmra.mrb[24].mxu0 %vm541_vm0, %v3230_v44 }
 0x163   : > { %4357 = vmatprep.mubr.msk.bf16.mxu0 %vm541_vm0, %v3232_v11 }
 0x168   : > { %4222 = vmatmul.mubr.msk.bf16.gmra.mrb[28].mxu1 %vm541_vm0, %v1939_v12 }
 0x16a   : > { %4358 = vmatmul.mubr.msk.bf16.gmra.mrb[28].mxu0 %vm541_vm0, %v3234_v36 }
 0x1e3   : > { %v4161_v55 = vpop.f32.mrb[0].mxu1 }
 0x1e4   : > { %v1624_v2 = vpop.f32.mrb[1].mxu1 }
 0x1e5   : > { %v4162_v23 = vpop.f32.mrb[2].mxu1 }
 0x1e6   : > { %v1627_v13 = vpop.f32.mrb[3].mxu1 }
 0x1eb   : > { %v4165_v8 = vpop.f32.mrb[4].mxu1 }
 0x1ec   : > { %v1640_v30 = vpop.f32.mrb[5].mxu1 }
 0x1ed   : > { %v4166_v34 = vpop.f32.mrb[6].mxu1 }
 0x1ee   : > { %v1643_v14 = vpop.f32.mrb[7].mxu1 }
 0x1f3   : > { %v4169_v60 = vpop.f32.mrb[8].mxu1 }
 0x1f4   : > { %v1656_v22 = vpop.f32.mrb[9].mxu1 }
 0x1f5   : > { %v4170_v45 = vpop.f32.mrb[10].mxu1 }
 0x1f6   : > { %v1659_v15 = vpop.f32.mrb[11].mxu1 }
 0x1fb   : > { %v4173_v51 = vpop.f32.mrb[12].mxu1 }
 0x1fc   : > { %v1672_v49 = vpop.f32.mrb[13].mxu1 }
 0x1fd   : > { %v4174_v40 = vpop.f32.mrb[14].mxu1 }
 0x1fe   : > { %v5808_v59 = vpop.f32.mrb[15].mxu1 }
 0x205   : > { %v4331_v21 = vpop.f32.mrb[0].mxu0 }
 0x206   : > { %v4363_v37 = vadd.f32 %v4331_v21, %v4161_v55  ;;  %v3323_v48 = vpop.f32.mrb[1].mxu0 }
 0x207   : > { %v4364_v16 = vadd.f32 %v3323_v48, %v1624_v2  ;;  %v4332_v33 = vpop.f32.mrb[2].mxu0 }
 0x208   : > { %v3490_v19 = vadd.f32 %v4363_v37, %v5817_v29  ;;  %v4365_v3 = vadd.f32 %v4332_v33, %v4162_v23  ;;  %v3326_v62 = vpop.f32.mrb[3].mxu0 }
 0x209   : > { %v3488_v58 = vadd.f32 %v4364_v16, %v5817_v29  ;;  %v4366_v26 = vadd.f32 %v3326_v62, %v1627_v13 }
 0x20a   : > { %3522 = vst [vmem:[%s5821_s8 + $0x10] sm:$0xff] %v3490_v19  ;;  %v3491_v31 = vadd.f32 %v4365_v3, %v5817_v29 }
 0x20b   : > { %3520 = vst [vmem:[%s5821_s8] sm:$0xff] %v3488_v58  ;;  %v3489_v1 = vadd.f32 %v4366_v26, %v5817_v29 }
 0x20c   : > { %3523 = vst [vmem:[%s5821_s8 + $0x18] sm:$0xff] %v3491_v31 }
 0x20d   : > { %3521 = vst [vmem:[%s5821_s8 + $0x8] sm:$0xff] %v3489_v1  ;;  %v4335_v46 = vpop.f32.mrb[4].mxu0 }
 0x20e   : > { %v4367_v6 = vadd.f32 %v4335_v46, %v4165_v8  ;;  %v3339_v63 = vpop.f32.mrb[5].mxu0 }
 0x20f   : > { %v4368_v41 = vadd.f32 %v3339_v63, %v1640_v30  ;;  %v4336_v47 = vpop.f32.mrb[6].mxu0 }
 0x210   : > { %v3494_v20 = vadd.f32 %v4367_v6, %v5817_v29  ;;  %v4369_v9 = vadd.f32 %v4336_v47, %v4166_v34  ;;  %v3342_v4 = vpop.f32.mrb[7].mxu0 }
 0x211   : > { %v3492_v57 = vadd.f32 %v4368_v41, %v5817_v29  ;;  %v4370_v53 = vadd.f32 %v3342_v4, %v1643_v14 }
 0x212   : > { %3526 = vst [vmem:[%s5821_s8 + $0x30] sm:$0xff] %v3494_v20  ;;  %v3495_v61 = vadd.f32 %v4369_v9, %v5817_v29 }
 0x213   : > { %3524 = vst [vmem:[%s5821_s8 + $0x20] sm:$0xff] %v3492_v57  ;;  %v3493_v25 = vadd.f32 %v4370_v53, %v5817_v29 }
 0x214   : > { %3527 = vst [vmem:[%s5821_s8 + $0x38] sm:$0xff] %v3495_v61 }
 0x215   : > { %3525 = vst [vmem:[%s5821_s8 + $0x28] sm:$0xff] %v3493_v25  ;;  %v4339_v39 = vpop.f32.mrb[8].mxu0 }
 0x216   : > { %v4371_v0 = vadd.f32 %v4339_v39, %v4169_v60  ;;  %v3355_v38 = vpop.f32.mrb[9].mxu0 }
 0x217   : > { %v4372_v52 = vadd.f32 %v3355_v38, %v1656_v22  ;;  %v4340_v18 = vpop.f32.mrb[10].mxu0 }
 0x218   : > { %v3498_v32 = vadd.f32 %v4371_v0, %v5817_v29  ;;  %v4373_v17 = vadd.f32 %v4340_v18, %v4170_v45  ;;  %v3358_v35 = vpop.f32.mrb[11].mxu0 }
 0x219   : > { %v3496_v7 = vadd.f32 %v4372_v52, %v5817_v29  ;;  %v4374_v24 = vadd.f32 %v3358_v35, %v1659_v15 }
 0x21a   : > { %3530 = vst [vmem:[%s5821_s8 + $0x50] sm:$0xff] %v3498_v32  ;;  %v3499_v42 = vadd.f32 %v4373_v17, %v5817_v29 }
 0x21b   : > { %3528 = vst [vmem:[%s5821_s8 + $0x40] sm:$0xff] %v3496_v7  ;;  %v3497_v5 = vadd.f32 %v4374_v24, %v5817_v29 }
 0x21c   : > { %3531 = vst [vmem:[%s5821_s8 + $0x58] sm:$0xff] %v3499_v42 }
 0x21d   : > { %3529 = vst [vmem:[%s5821_s8 + $0x48] sm:$0xff] %v3497_v5  ;;  %v4343_v56 = vpop.f32.mrb[12].mxu0 }
 0x21e   : > { %v4375_v50 = vadd.f32 %v4343_v56, %v4173_v51  ;;  %v3371_v43 = vpop.f32.mrb[13].mxu0 }
 0x21f   : > { %v4376_v27 = vadd.f32 %v3371_v43, %v1672_v49  ;;  %v4344_v28 = vpop.f32.mrb[14].mxu0 }
 0x220   : > { %v3502_v44 = vadd.f32 %v4375_v50, %v5817_v29  ;;  %v4377_v11 = vadd.f32 %v4344_v28, %v4174_v40  ;;  %v3374_v54 = vpop.f32.mrb[15].mxu0 }
 0x221   : > { %v3500_v10 = vadd.f32 %v4376_v27, %v5817_v29  ;;  %v4378_v12 = vadd.f32 %v3374_v54, %v5808_v59 }
 0x222   : > { %3534 = vst [vmem:[%s5821_s8 + $0x70] sm:$0xff] %v3502_v44  ;;  %v3503_v36 = vadd.f32 %v4377_v11, %v5817_v29 }
 0x223   : > { %3532 = vst [vmem:[%s5821_s8 + $0x60] sm:$0xff] %v3500_v10  ;;  %v3501_v55 = vadd.f32 %v4378_v12, %v5817_v29  ;;  %v4211_v2 = vpop.f32.mrb[16].mxu1 }
 0x224   : > { %3535 = vst [vmem:[%s5821_s8 + $0x78] sm:$0xff] %v3503_v36  ;;  %v2092_v23 = vpop.f32.mrb[17].mxu1 }
 0x225   : > { %3533 = vst [vmem:[%s5821_s8 + $0x68] sm:$0xff] %v3501_v55  ;;  %v4347_v13 = vpop.f32.mrb[16].mxu0  ;;  %v4212_v8 = vpop.f32.mrb[18].mxu1 }
 0x226   : > { %v4379_v30 = vadd.f32 %v4347_v13, %v4211_v2  ;;  %v3387_v34 = vpop.f32.mrb[17].mxu0  ;;  %v2095_v14 = vpop.f32.mrb[19].mxu1 }
 0x227   : > { %v4380_v60 = vadd.f32 %v3387_v34, %v2092_v23  ;;  %v4348_v22 = vpop.f32.mrb[18].mxu0 }
 0x228   : > { %v3506_v45 = vadd.f32 %v4379_v30, %v5817_v29  ;;  %v4381_v15 = vadd.f32 %v4348_v22, %v4212_v8  ;;  %v3390_v51 = vpop.f32.mrb[19].mxu0 }
 0x229   : > { %v3504_v49 = vadd.f32 %v4380_v60, %v5817_v29  ;;  %v4382_v40 = vadd.f32 %v3390_v51, %v2095_v14 }
 0x22a   : > { %3538 = vst [vmem:[%s5821_s8 + $0x90] sm:$0xff] %v3506_v45  ;;  %v3507_v59 = vadd.f32 %v4381_v15, %v5817_v29 }
 0x22b   : > { %3536 = vst [vmem:[%s5821_s8 + $0x80] sm:$0xff] %v3504_v49  ;;  %v3505_v21 = vadd.f32 %v4382_v40, %v5817_v29  ;;  %v4215_v37 = vpop.f32.mrb[20].mxu1 }
 0x22c   : > { %3539 = vst [vmem:[%s5821_s8 + $0x98] sm:$0xff] %v3507_v59  ;;  %v2108_v48 = vpop.f32.mrb[21].mxu1 }
 0x22d   : > { %3537 = vst [vmem:[%s5821_s8 + $0x88] sm:$0xff] %v3505_v21  ;;  %v4351_v16 = vpop.f32.mrb[20].mxu0  ;;  %v4216_v33 = vpop.f32.mrb[22].mxu1 }
 0x22e   : > { %v4383_v19 = vadd.f32 %v4351_v16, %v4215_v37  ;;  %v3403_v3 = vpop.f32.mrb[21].mxu0  ;;  %v2111_v62 = vpop.f32.mrb[23].mxu1 }
 0x22f   : > { %v4384_v58 = vadd.f32 %v3403_v3, %v2108_v48  ;;  %v4352_v26 = vpop.f32.mrb[22].mxu0 }
 0x230   : > { %v3510_v31 = vadd.f32 %v4383_v19, %v5817_v29  ;;  %v4385_v1 = vadd.f32 %v4352_v26, %v4216_v33  ;;  %v3406_v46 = vpop.f32.mrb[23].mxu0 }
 0x231   : > { %v3508_v6 = vadd.f32 %v4384_v58, %v5817_v29  ;;  %v4386_v63 = vadd.f32 %v3406_v46, %v2111_v62 }
 0x232   : > { %3542 = vst [vmem:[%s5821_s8 + $0xb0] sm:$0xff] %v3510_v31  ;;  %v3511_v41 = vadd.f32 %v4385_v1, %v5817_v29 }
 0x233   : > { %3540 = vst [vmem:[%s5821_s8 + $0xa0] sm:$0xff] %v3508_v6  ;;  %v3509_v47 = vadd.f32 %v4386_v63, %v5817_v29  ;;  %v4219_v20 = vpop.f32.mrb[24].mxu1 }
 0x234   : > { %3543 = vst [vmem:[%s5821_s8 + $0xb8] sm:$0xff] %v3511_v41  ;;  %v2124_v9 = vpop.f32.mrb[25].mxu1 }
 0x235   : > { %3541 = vst [vmem:[%s5821_s8 + $0xa8] sm:$0xff] %v3509_v47  ;;  %v4355_v4 = vpop.f32.mrb[24].mxu0  ;;  %v4220_v57 = vpop.f32.mrb[26].mxu1 }
 0x236   : > { %v4387_v53 = vadd.f32 %v4355_v4, %v4219_v20  ;;  %v3419_v61 = vpop.f32.mrb[25].mxu0  ;;  %v2127_v25 = vpop.f32.mrb[27].mxu1 }
 0x237   : > { %v4388_v39 = vadd.f32 %v3419_v61, %v2124_v9  ;;  %v4356_v0 = vpop.f32.mrb[26].mxu0 }
 0x238   : > { %v3514_v38 = vadd.f32 %v4387_v53, %v5817_v29  ;;  %v4389_v52 = vadd.f32 %v4356_v0, %v4220_v57  ;;  %v3422_v18 = vpop.f32.mrb[27].mxu0 }
 0x239   : > { %v3512_v32 = vadd.f32 %v4388_v39, %v5817_v29  ;;  %v4390_v17 = vadd.f32 %v3422_v18, %v2127_v25 }
 0x23a   : > { %3546 = vst [vmem:[%s5821_s8 + $0xd0] sm:$0xff] %v3514_v38  ;;  %v3515_v35 = vadd.f32 %v4389_v52, %v5817_v29 }
 0x23b   : > { %3544 = vst [vmem:[%s5821_s8 + $0xc0] sm:$0xff] %v3512_v32  ;;  %v3513_v7 = vadd.f32 %v4390_v17, %v5817_v29  ;;  %v4223_v24 = vpop.f32.mrb[28].mxu1 }
 0x23c   : > { %3547 = vst [vmem:[%s5821_s8 + $0xd8] sm:$0xff] %v3515_v35  ;;  %v2140_v42 = vpop.f32.mrb[29].mxu1 }
 0x23d   : > { %3545 = vst [vmem:[%s5821_s8 + $0xc8] sm:$0xff] %v3513_v7  ;;  %v4359_v5 = vpop.f32.mrb[28].mxu0  ;;  %v4224_v56 = vpop.f32.mrb[30].mxu1 }
 0x23e   : > { %v4391_v50 = vadd.f32 %v4359_v5, %v4223_v24  ;;  %v3435_v43 = vpop.f32.mrb[29].mxu0  ;;  %v2143_v27 = vpop.f32.mrb[31].mxu1 }
 0x23f   : > { %v4392_v28 = vadd.f32 %v3435_v43, %v2140_v42  ;;  %v4360_v44 = vpop.f32.mrb[30].mxu0 }
 0x240   : > { %v3518_v11 = vadd.f32 %v4391_v50, %v5817_v29  ;;  %v4393_v54 = vadd.f32 %v4360_v44, %v4224_v56  ;;  %v3438_v10 = vpop.f32.mrb[31].mxu0 }
 0x241   : > { %v3516_v12 = vadd.f32 %v4392_v28, %v5817_v29  ;;  %v4394_v36 = vadd.f32 %v3438_v10, %v2143_v27 }
 0x242   : > { %3550 = vst [vmem:[%s5821_s8 + $0xf0] sm:$0xff] %v3518_v11  ;;  %v3519_v55 = vadd.f32 %v4393_v54, %v5817_v29 }
 0x243   : > { %3548 = vst [vmem:[%s5821_s8 + $0xe0] sm:$0xff] %v3516_v12  ;;  %v3517_v2 = vadd.f32 %v4394_v36, %v5817_v29 }
 0x244   : > { %3551 = vst [vmem:[%s5821_s8 + $0xf8] sm:$0xff] %v3519_v55 }
 0x245   : > { %3549 = vst [vmem:[%s5821_s8 + $0xe8] sm:$0xff] %v3517_v2 }
 0x246   : > { %4753 = shalt.err (!%p4750_p0)
}
 0x247   : > { %s4754_s14 = scalar_lea.hbm %s5886_s13, 4096  ;;  %s4758_s20 = scalar_lea.hbm %s5960_s4, 24576 }
 0x248   : > { %p4755_p1 = scmp.ne.s32.totalorder %s5886_s13, %s4754_s14  ;;  %p4759_p4 = scmp.lt.u32.totalorder %s5886_s13, %s5960_s4 }
 0x249   : > { %p4760_p5 = scmp.lt.u32.totalorder %s4758_s20, %s4754_s14  ;;  %p4762_p8 = scmp.lt.u32.totalorder %s4754_s14, %s5886_s13 }
 0x24a   : > { %p4756_p2 = pnand %p4755_p1, %p4953_p7 }
 0x24b   : > { %p4761_p6 = por %p4760_p5, %p4759_p4 }
 0x24c   : > { %p4757_p3 = pneg %p4756_p2 }
 0x24d   : > { %p4763_p9 = por %p4762_p8, %p4761_p6 }
 0x24f   : > { %p4764_p10 = pnand %p4763_p9, %p4757_p3 }
 0x251   : > { %4767 = shalt.err (!%p4764_p10)
}
 0x252   : > { %s4853_s18 = smov 128   ;;  %s4854_s26 = smov 256  }
 0x253   : > { %s4855_s5 = smov 8  }
 0x254   : > { %4621 = dma.vmem_to_hbm [thread:$0]  (%p4953_p7), %s5890_s6, 4096, %s5886_s13, %s5898_s25, %s4853_s18, %s4854_s26, %s4855_s5  }
 0x255 PF: > { %p4627_p11 = scmp.ge.s32.totalorder %s4850_s24, 2  ;;  %s3583_s29 = sand.u32 1, %s4814_s15  }
 0x256   : > { %s3584_s14 = scalar_lea.sflag [#allocation5], %s3583_s29 }
 0x257   : > { %p4624_p13 = pnand %p4627_p11, %p4961_p12 }
 0x259   : > { %4809 = dma.done.wait (!%p4624_p13), %s3584_s14, 4096  }
 0x25a   : > { %4811 = vsyncadd (!%p4624_p13), %s3584_s14, 4294963200  ;;  %s17_s24 = sadd.s32 1, %s4850_s24   ;;  %s5989_s15 = smov %s4818_s16 }
 0x25b   : > { %p14_p0 = scmp.ge.s32.totalorder %s17_s24, 8   ;;  %s5990_s16 = smov %s4822_s17 }
 0x25c   : > { %s5991_s17 = smov %s4969_s12  ;;  %s5992_s18 = smov %s4830_s19 }
 0x25d   : > { %s5993_s19 = smov %s4966_s11  ;;  %s5994_s20 = smov %s4842_s22 }
 0x25e   : > { %s5995_s21 = smov %s4846_s23  ;;  %s5996_s22 = smov %s5999_s27 }
 0x25f   : > { %s5997_s23 = smov %s6003_s28  ;;  %16 = sbr.rel (!%p14_p0) target bundleno = 6 (0x6), region = 134 }
 0x266   :  { %3589 = vsyncpa [#allocation5], 1 }
 0x267   :  { %3591 = vsyncpa [#allocation5 + $0x1], 1 }

</bundles_post_ra>
